<compile_context>
chip_gen: v7x
topology: tpu7x:2x2x1
jax: 0.10.0
libtpu: 0.0.40
codegen_flags: <defaults>
</compile_context>

<pallas_src>
import functools

import jax
import jax.numpy as jnp
from jax import lax
from jax.experimental import pallas as pl
from jax.experimental.pallas import tpu as pltpu


def _round_up(x, m):
    return ((x + m - 1) // m) * m


def _nt_xent_kernel(zr_ref, zc_ref, loss_ref, m_sc, l_sc, pos_sc, *,
                    n_valid, batch_times_world, temperature, tm, tn):
    """One (row-tile, col-tile) step of the online-logsumexp NT-Xent loss."""
    i = pl.program_id(0)          # row tile
    j = pl.program_id(1)          # column tile (reduction axis)

    @pl.when(j == 0)
    def _init():
        m_sc[...] = jnp.full_like(m_sc, -1e30)
        l_sc[...] = jnp.zeros_like(l_sc)
        pos_sc[...] = jnp.zeros_like(pos_sc)

    eps_sq = jnp.float32(1e-16)                      # PyTorch cosine eps=1e-8, per-row clamp
    inv_t = jnp.float32(1.0 / temperature)

    zr = zr_ref[...].astype(jnp.float32)             # (tm, Dp)
    zc = zc_ref[...].astype(jnp.float32)             # (tn, Dp)
    zr = zr * (lax.rsqrt(jnp.maximum(jnp.sum(zr * zr, -1, keepdims=True), eps_sq)) * inv_t)
    zc = zc * lax.rsqrt(jnp.maximum(jnp.sum(zc * zc, -1, keepdims=True), eps_sq))

    # (tm, tn) scaled cosine-similarity logits straight off the MXU (no transpose).
    sim = lax.dot_general(zr, zc, dimension_numbers=(((1,), (1,)), ((), ())),
                          preferred_element_type=jnp.float32)

    row = i * tm + lax.broadcasted_iota(jnp.int32, (tm, tn), 0)
    col = j * tn + lax.broadcasted_iota(jnp.int32, (tm, tn), 1)

    # Exclude self-similarity and padded columns from the logsumexp.
    neg_big = jnp.float32(-1e30)
    masked = jnp.where((col == row) | (col >= n_valid), neg_big, sim)

    # Online logsumexp update.
    m_prev = m_sc[...]
    m_new = jnp.maximum(m_prev, jnp.max(masked, axis=-1, keepdims=True))
    alpha = jnp.exp(m_prev - m_new)
    l_sc[...] = alpha * l_sc[...] + jnp.sum(jnp.exp(masked - m_new), axis=-1, keepdims=True)
    m_sc[...] = m_new

    # Positive-pair logit: only touch column tiles that can contain
    # (row + B) mod N for some row of this row tile.
    n = n_valid
    r0 = i * tm
    c0 = j * tn
    lo = r0 + batch_times_world
    hi = lo + tm
    has_pos = jnp.logical_or(
        jnp.logical_and(lo < c0 + tn, c0 < hi),
        jnp.logical_and(lo < c0 + tn + n, c0 + n < hi))

    @pl.when(has_pos)
    def _pos():
        pos_col = row + batch_times_world
        pos_col = jnp.where(pos_col >= n, pos_col - n, pos_col)
        pm = col == pos_col
        pos_sc[...] += jnp.sum(jnp.where(pm, sim, 0.0), axis=-1, keepdims=True)

    @pl.when(j == pl.num_programs(1) - 1)
    def _finalize():
        ridx = r0 + lax.broadcasted_iota(jnp.int32, (tm, 1), 0)
        lse = m_sc[...] + jnp.log(l_sc[...])
        per_row = jnp.where(ridx < n, lse - pos_sc[...], 0.0)
        loss_ref[...] = per_row


def nt_xent_loss(z_i, z_j, temperature=0.5):
    """NT-Xent loss (world_size = 1, label_smoothing = 0)."""
    B, D = z_i.shape
    N = 2 * B
    z = jnp.concatenate([z_i, z_j], axis=0).astype(jnp.float32)     # (N, D)

    # Tile sizes: 128/256-aligned; for large N use 256x512 blocks (fits well
    # under the 32 MiB default scoped VMEM on every generation incl. v7x).
    if N <= 128:
        n_pad, tm, tn = 128, 128, 128
    elif N <= 256:
        n_pad, tm, tn = 256, 256, 256
    else:
        tm, tn = 256, 512
        n_pad = _round_up(N, 512)
    d_pad = _round_up(D, 128)

    z = jnp.pad(z, ((0, n_pad - N), (0, d_pad - D)))

    grid = (n_pad // tm, n_pad // tn)
    kernel = functools.partial(
        _nt_xent_kernel,
        n_valid=N, batch_times_world=B, temperature=float(temperature),
        tm=tm, tn=tn)

    per_row = pl.pallas_call(
        kernel,
        out_shape=jax.ShapeDtypeStruct((n_pad, 1), jnp.float32),
        grid_spec=pltpu.PrefetchScalarGridSpec(
            num_scalar_prefetch=0,
            grid=grid,
            in_specs=[
                pl.BlockSpec((tm, d_pad), lambda i, j: (i, 0)),   # row stream
                pl.BlockSpec((tn, d_pad), lambda i, j: (j, 0)),   # column stream
            ],
            out_specs=pl.BlockSpec((tm, 1), lambda i, j: (i, 0)),
            scratch_shapes=[pltpu.VMEM((tm, 1), jnp.float32),     # running max
                            pltpu.VMEM((tm, 1), jnp.float32),     # running sum-exp
                            pltpu.VMEM((tm, 1), jnp.float32)]),   # positive logit
        compiler_params=pltpu.CompilerParams(
            dimension_semantics=("parallel", "arbitrary"),
            vmem_limit_bytes=32 * 1024 * 1024),
    )(z, z)

    return jnp.sum(per_row) / jnp.float32(N)


def _reference_nt_xent(z_i, z_j, temperature=0.5):
    """Pure-JAX mirror of the PyTorch forward (world_size=1) for validation."""
    B, _ = z_i.shape
    N = 2 * B
    z = jnp.concatenate([z_i, z_j], axis=0).astype(jnp.float32)
    norms = jnp.linalg.norm(z, axis=-1, keepdims=True)
    sim = (z @ z.T) / jnp.maximum(norms * norms.T, 1e-8) / temperature
    pos = jnp.concatenate([jnp.diagonal(sim, B), jnp.diagonal(sim, -B)])  # (N,)
    masked = jnp.where(jnp.eye(N, dtype=bool), -jnp.inf, sim)
    lse = jax.scipy.special.logsumexp(masked, axis=-1)
    # CrossEntropyLoss(reduction='sum') on [pos, negatives] with label 0, / N
    return jnp.mean(lse - pos)


if __name__ == "__main__":
    key = jax.random.PRNGKey(0)

    # Small shape consistent with the module (flat embeddings).
    k1, k2 = jax.random.split(key)
    B, D = 4, 32
    temperature = 0.5
    z_i = jax.random.normal(k1, (B, D), dtype=jnp.float32)
    z_j = jax.random.normal(k2, (B, D), dtype=jnp.float32)

    loss = jax.block_until_ready(nt_xent_loss(z_i, z_j, temperature))
    ref = _reference_nt_xent(z_i, z_j, temperature)
    assert jnp.allclose(loss, ref, rtol=1e-5, atol=1e-5), (loss, ref)

    # Second check exercising multi-tile grid, online LSE across column tiles,
    # wrap-around positives and D/N padding.
    k3, k4 = jax.random.split(jax.random.PRNGKey(1))
    B2, D2 = 320, 40
    z_i2 = jax.random.normal(k3, (B2, D2), dtype=jnp.float32)
    z_j2 = jax.random.normal(k4, (B2, D2), dtype=jnp.float32)
    loss2 = jax.block_until_ready(nt_xent_loss(z_i2, z_j2, temperature))
    ref2 = _reference_nt_xent(z_i2, z_j2, temperature)
    assert jnp.allclose(loss2, ref2, rtol=1e-4, atol=1e-5), (loss2, ref2)

    print("KERNEL_OK")
</pallas_src>

<mosaic_0001>
module attributes {stable_mosaic.version = 11 : i64} {
  func.func @_nt_xent_kernel(%arg0: i32, %arg1: i32, %arg2: memref<128x128xf32, #tpu.memory_space<vmem>>, %arg3: memref<128x128xf32, #tpu.memory_space<vmem>>, %arg4: memref<128x1xf32, #tpu.memory_space<vmem>>, %arg5: memref<128x1xf32, #tpu.memory_space<vmem>>, %arg6: memref<128x1xf32, #tpu.memory_space<vmem>>, %arg7: memref<128x1xf32, #tpu.memory_space<vmem>>) attributes {dimension_semantics = [#tpu.dimension_semantics<parallel>, #tpu.dimension_semantics<arbitrary>], iteration_bounds = array<i64: 1, 1>, scalar_prefetch = 0 : i64, scratch_operands = 3 : i64, tpu.core_type = #tpu.core_type<tc>, window_params = [{transform_indices = @transform_0, window_bounds = array<i64: 128, 128>}, {transform_indices = @transform_1, window_bounds = array<i64: 128, 128>}, {transform_indices = @transform_2, window_bounds = array<i64: 128, 1>}]} {
    %c0_i32 = arith.constant 0 : i32
    %0 = arith.cmpi eq, %arg1, %c0_i32 : i32
    %1 = arith.extui %0 : i1 to i32
    %c0_i32_0 = arith.constant 0 : i32
    %2 = arith.cmpi ne, %1, %c0_i32_0 : i32
    scf.if %2 {
      %cst_31 = arith.constant -1.000000e+30 : f32
      %74 = vector.broadcast %cst_31 : f32 to vector<128x1xf32>
      %c0_32 = arith.constant 0 : index
      %c0_33 = arith.constant 0 : index
      %75 = vector.load %arg5[%c0_32, %c0_33] : memref<128x1xf32, #tpu.memory_space<vmem>>, vector<128x1xf32>
      tpu.vector_store %arg5[%c0_32, %c0_33], %74 {strides = array<i32>} : memref<128x1xf32, #tpu.memory_space<vmem>>, vector<128x1xf32>,
      %cst_34 = arith.constant 0.000000e+00 : f32
      %76 = vector.broadcast %cst_34 : f32 to vector<128x1xf32>
      %c0_35 = arith.constant 0 : index
      %c0_36 = arith.constant 0 : index
      %77 = vector.load %arg6[%c0_35, %c0_36] : memref<128x1xf32, #tpu.memory_space<vmem>>, vector<128x1xf32>
      tpu.vector_store %arg6[%c0_35, %c0_36], %76 {strides = array<i32>} : memref<128x1xf32, #tpu.memory_space<vmem>>, vector<128x1xf32>,
      %cst_37 = arith.constant 0.000000e+00 : f32
      %78 = vector.broadcast %cst_37 : f32 to vector<128x1xf32>
      %c0_38 = arith.constant 0 : index
      %c0_39 = arith.constant 0 : index
      %79 = vector.load %arg7[%c0_38, %c0_39] : memref<128x1xf32, #tpu.memory_space<vmem>>, vector<128x1xf32>
      tpu.vector_store %arg7[%c0_38, %c0_39], %78 {strides = array<i32>} : memref<128x1xf32, #tpu.memory_space<vmem>>, vector<128x1xf32>,
    } else {
    }
    %c0 = arith.constant 0 : index
    %c0_1 = arith.constant 0 : index
    %3 = vector.load %arg2[%c0, %c0_1] : memref<128x128xf32, #tpu.memory_space<vmem>>, vector<128x128xf32>
    %c0_2 = arith.constant 0 : index
    %c0_3 = arith.constant 0 : index
    %4 = vector.load %arg3[%c0_2, %c0_3] : memref<128x128xf32, #tpu.memory_space<vmem>>, vector<128x128xf32>
    %5 = arith.mulf %3, %3 : vector<128x128xf32>
    %cst = arith.constant dense<0.000000e+00> : vector<128xf32>
    %6 = vector.multi_reduction <add>, %5, %cst [1] : vector<128x128xf32> to vector<128xf32>
    %7 = vector.shape_cast %6 : vector<128xf32> to vector<128x1xf32>
    %cst_4 = arith.constant 1.000000e-16 : f32
    %8 = vector.broadcast %cst_4 : f32 to vector<128x1xf32>
    %9 = arith.maximumf %7, %8 : vector<128x1xf32>
    %10 = math.rsqrt %9 : vector<128x1xf32>
    %cst_5 = arith.constant 2.000000e+00 : f32
    %11 = vector.broadcast %cst_5 : f32 to vector<128x1xf32>
    %12 = arith.mulf %10, %11 : vector<128x1xf32>
    %13 = vector.broadcast %12 : vector<128x1xf32> to vector<128x128xf32>
    %14 = arith.mulf %3, %13 : vector<128x128xf32>
    %15 = arith.mulf %4, %4 : vector<128x128xf32>
    %cst_6 = arith.constant dense<0.000000e+00> : vector<128xf32>
    %16 = vector.multi_reduction <add>, %15, %cst_6 [1] : vector<128x128xf32> to vector<128xf32>
    %17 = vector.shape_cast %16 : vector<128xf32> to vector<128x1xf32>
    %cst_7 = arith.constant 1.000000e-16 : f32
    %18 = vector.broadcast %cst_7 : f32 to vector<128x1xf32>
    %19 = arith.maximumf %17, %18 : vector<128x1xf32>
    %20 = math.rsqrt %19 : vector<128x1xf32>
    %21 = vector.broadcast %20 : vector<128x1xf32> to vector<128x128xf32>
    %22 = arith.mulf %4, %21 : vector<128x128xf32>
    %cst_8 = arith.constant dense<0.000000e+00> : vector<128x128xf32>
    %23 = tpu.matmul %14, %22, %cst_8 {dimension_numbers = #tpu.dot_dimension_numbers<[1], [1], [0], [0], [0, 0, 1, 0], [], []>} : vector<128x128xf32>, vector<128x128xf32>, vector<128x128xf32> -> vector<128x128xf32>
    %c128_i32 = arith.constant 128 : i32
    %24 = arith.muli %arg0, %c128_i32 : i32
    %25 = tpu.iota {dimensions = array<i32: 0>} : vector<128x128xi32>
    %26 = vector.broadcast %24 : i32 to vector<128x128xi32>
    %27 = arith.addi %26, %25 : vector<128x128xi32>
    %c128_i32_9 = arith.constant 128 : i32
    %28 = arith.muli %arg1, %c128_i32_9 : i32
    %29 = tpu.iota {dimensions = array<i32: 1>} : vector<128x128xi32>
    %30 = vector.broadcast %28 : i32 to vector<128x128xi32>
    %31 = arith.addi %30, %29 : vector<128x128xi32>
    %32 = arith.cmpi eq, %31, %27 : vector<128x128xi32>
    %c8_i32 = arith.constant 8 : i32
    %33 = vector.broadcast %c8_i32 : i32 to vector<128x128xi32>
    %34 = arith.cmpi sge, %31, %33 : vector<128x128xi32>
    %35 = arith.ori %32, %34 : vector<128x128xi1>
    %cst_10 = arith.constant -1.000000e+30 : f32
    %36 = vector.broadcast %cst_10 : f32 to vector<128x128xf32>
    %37 = arith.select %35, %36, %23 : vector<128x128xi1>, vector<128x128xf32>
    %c0_11 = arith.constant 0 : index
    %c0_12 = arith.constant 0 : index
    %38 = vector.load %arg5[%c0_11, %c0_12] : memref<128x1xf32, #tpu.memory_space<vmem>>, vector<128x1xf32>
    %cst_13 = arith.constant dense<0xFF800000> : vector<128xf32>
    %39 = vector.multi_reduction <maximumf>, %37, %cst_13 [1] : vector<128x128xf32> to vector<128xf32>
    %40 = vector.shape_cast %39 : vector<128xf32> to vector<128x1xf32>
    %41 = arith.maximumf %38, %40 : vector<128x1xf32>
    %42 = arith.subf %38, %41 : vector<128x1xf32>
    %43 = math.exp %42 : vector<128x1xf32>
    %c0_14 = arith.constant 0 : index
    %c0_15 = arith.constant 0 : index
    %44 = vector.load %arg6[%c0_14, %c0_15] : memref<128x1xf32, #tpu.memory_space<vmem>>, vector<128x1xf32>
    %45 = arith.mulf %43, %44 : vector<128x1xf32>
    %46 = vector.broadcast %41 : vector<128x1xf32> to vector<128x128xf32>
    %47 = arith.subf %37, %46 : vector<128x128xf32>
    %48 = math.exp %47 : vector<128x128xf32>
    %cst_16 = arith.constant dense<0.000000e+00> : vector<128xf32>
    %49 = vector.multi_reduction <add>, %48, %cst_16 [1] : vector<128x128xf32> to vector<128xf32>
    %50 = vector.shape_cast %49 : vector<128xf32> to vector<128x1xf32>
    %51 = arith.addf %45, %50 : vector<128x1xf32>
    %c0_17 = arith.constant 0 : index
    %c0_18 = arith.constant 0 : index
    %52 = vector.load %arg6[%c0_17, %c0_18] : memref<128x1xf32, #tpu.memory_space<vmem>>, vector<128x1xf32>
    tpu.vector_store %arg6[%c0_17, %c0_18], %51 {strides = array<i32>} : memref<128x1xf32, #tpu.memory_space<vmem>>, vector<128x1xf32>,
    %c0_19 = arith.constant 0 : index
    %c0_20 = arith.constant 0 : index
    %53 = vector.load %arg5[%c0_19, %c0_20] : memref<128x1xf32, #tpu.memory_space<vmem>>, vector<128x1xf32>
    tpu.vector_store %arg5[%c0_19, %c0_20], %41 {strides = array<i32>} : memref<128x1xf32, #tpu.memory_space<vmem>>, vector<128x1xf32>,
    %c128_i32_21 = arith.constant 128 : i32
    %54 = arith.muli %arg0, %c128_i32_21 : i32
    %c128_i32_22 = arith.constant 128 : i32
    %55 = arith.muli %arg1, %c128_i32_22 : i32
    %c4_i32 = arith.constant 4 : i32
    %56 = arith.addi %54, %c4_i32 : i32
    %c128_i32_23 = arith.constant 128 : i32
    %57 = arith.addi %56, %c128_i32_23 : i32
    %c128_i32_24 = arith.constant 128 : i32
    %58 = arith.addi %55, %c128_i32_24 : i32
    %59 = arith.cmpi slt, %56, %58 : i32
    %60 = arith.cmpi slt, %55, %57 : i32
    %61 = arith.andi %59, %60 : i1
    %c128_i32_25 = arith.constant 128 : i32
    %62 = arith.addi %55, %c128_i32_25 : i32
    %c8_i32_26 = arith.constant 8 : i32
    %63 = arith.addi %62, %c8_i32_26 : i32
    %64 = arith.cmpi slt, %56, %63 : i32
    %c8_i32_27 = arith.constant 8 : i32
    %65 = arith.addi %55, %c8_i32_27 : i32
    %66 = arith.cmpi slt, %65, %57 : i32
    %67 = arith.andi %64, %66 : i1
    %68 = arith.ori %61, %67 : i1
    %69 = arith.extui %68 : i1 to i32
    %c0_i32_28 = arith.constant 0 : i32
    %70 = arith.cmpi ne, %69, %c0_i32_28 : i32
    scf.if %70 {
      %c4_i32_31 = arith.constant 4 : i32
      %74 = vector.broadcast %c4_i32_31 : i32 to vector<128x128xi32>
      %75 = arith.addi %27, %74 : vector<128x128xi32>
      %c8_i32_32 = arith.constant 8 : i32
      %76 = vector.broadcast %c8_i32_32 : i32 to vector<128x128xi32>
      %77 = arith.cmpi sge, %75, %76 : vector<128x128xi32>
      %c8_i32_33 = arith.constant 8 : i32
      %78 = vector.broadcast %c8_i32_33 : i32 to vector<128x128xi32>
      %79 = arith.subi %75, %78 : vector<128x128xi32>
      %80 = arith.select %77, %79, %75 : vector<128x128xi1>, vector<128x128xi32>
      %81 = arith.cmpi eq, %31, %80 : vector<128x128xi32>
      %c0_34 = arith.constant 0 : index
      %c0_35 = arith.constant 0 : index
      %82 = vector.load %arg7[%c0_34, %c0_35] : memref<128x1xf32, #tpu.memory_space<vmem>>, vector<128x1xf32>
      %cst_36 = arith.constant 0.000000e+00 : f32
      %83 = vector.broadcast %cst_36 : f32 to vector<128x128xf32>
      %84 = arith.select %81, %23, %83 : vector<128x128xi1>, vector<128x128xf32>
      %cst_37 = arith.constant dense<0.000000e+00> : vector<128xf32>
      %85 = vector.multi_reduction <add>, %84, %cst_37 [1] : vector<128x128xf32> to vector<128xf32>
      %86 = vector.shape_cast %85 : vector<128xf32> to vector<128x1xf32>
      %87 = arith.addf %82, %86 : vector<128x1xf32>
      %c0_38 = arith.constant 0 : index
      %c0_39 = arith.constant 0 : index
      %88 = vector.load %arg7[%c0_38, %c0_39] : memref<128x1xf32, #tpu.memory_space<vmem>>, vector<128x1xf32>
      tpu.vector_store %arg7[%c0_38, %c0_39], %87 {strides = array<i32>} : memref<128x1xf32, #tpu.memory_space<vmem>>, vector<128x1xf32>,
    } else {
    }
    %c0_i32_29 = arith.constant 0 : i32
    %71 = arith.cmpi eq, %arg1, %c0_i32_29 : i32
    %72 = arith.extui %71 : i1 to i32
    %c0_i32_30 = arith.constant 0 : i32
    %73 = arith.cmpi ne, %72, %c0_i32_30 : i32
    scf.if %73 {
      %74 = tpu.iota {dimensions = array<i32: 0>} : vector<128x1xi32>
      %75 = vector.broadcast %54 : i32 to vector<128x1xi32>
      %76 = arith.addi %75, %74 : vector<128x1xi32>
      %c0_31 = arith.constant 0 : index
      %c0_32 = arith.constant 0 : index
      %77 = vector.load %arg5[%c0_31, %c0_32] : memref<128x1xf32, #tpu.memory_space<vmem>>, vector<128x1xf32>
      %c0_33 = arith.constant 0 : index
      %c0_34 = arith.constant 0 : index
      %78 = vector.load %arg6[%c0_33, %c0_34] : memref<128x1xf32, #tpu.memory_space<vmem>>, vector<128x1xf32>
      %79 = math.log %78 : vector<128x1xf32>
      %80 = arith.addf %77, %79 : vector<128x1xf32>
      %c8_i32_35 = arith.constant 8 : i32
      %81 = vector.broadcast %c8_i32_35 : i32 to vector<128x1xi32>
      %82 = arith.cmpi slt, %76, %81 : vector<128x1xi32>
      %c0_36 = arith.constant 0 : index
      %c0_37 = arith.constant 0 : index
      %83 = vector.load %arg7[%c0_36, %c0_37] : memref<128x1xf32, #tpu.memory_space<vmem>>, vector<128x1xf32>
      %84 = arith.subf %80, %83 : vector<128x1xf32>
      %cst_38 = arith.constant 0.000000e+00 : f32
      %85 = vector.broadcast %cst_38 : f32 to vector<128x1xf32>
      %86 = arith.select %82, %84, %85 : vector<128x1xi1>, vector<128x1xf32>
      %c0_39 = arith.constant 0 : index
      %c0_40 = arith.constant 0 : index
      %87 = vector.load %arg4[%c0_39, %c0_40] : memref<128x1xf32, #tpu.memory_space<vmem>>, vector<128x1xf32>
      tpu.vector_store %arg4[%c0_39, %c0_40], %86 {strides = array<i32>} : memref<128x1xf32, #tpu.memory_space<vmem>>, vector<128x1xf32>,
    } else {
    }
    return
  }
  func.func @transform_0(%arg0: i32, %arg1: i32) -> (i32, i32) {
    %c0_i32 = arith.constant 0 : i32
    %c0_i32_0 = arith.constant 0 : i32
    return %arg0, %c0_i32 : i32, i32
  }
  func.func @transform_1(%arg0: i32, %arg1: i32) -> (i32, i32) {
    %c0_i32 = arith.constant 0 : i32
    %c0_i32_0 = arith.constant 0 : i32
    return %arg1, %c0_i32 : i32, i32
  }
  func.func @transform_2(%arg0: i32, %arg1: i32) -> (i32, i32) {
    %c0_i32 = arith.constant 0 : i32
    %c0_i32_0 = arith.constant 0 : i32
    return %arg0, %c0_i32 : i32, i32
  }
}

</mosaic_0001>

<bundles_post_ra>
// kernel: tpu_custom_call.1
= control target key start
LH: loop header
LB: loop body
LE: loop exit
PB: predicated region body
PF: predicated region fallthrough
CT: control target
= control target key end

     0   :  { %7 = vsyncpa [#allocation6], 0  ;;  %s2538_s0 = inlined_call_operand.hbm [shape: f32[128,128], index: 0, kind: input, shape index: {}]   ;;  %s2539_s1 = inlined_call_operand.hbm [shape: f32[128,128], index: 1, kind: input, shape index: {}]   ;;  %s2540_s2 = inlined_call_operand.vmem [shape: f32[128,1], index: 2, kind: output, shape index: {}]  }
   0x1   :  { %8 = vsyncpa [#allocation8], 0  ;;  %s1620_s9 = smov [#allocation5]   ;;  %s1572_s13 = scalar_lea.hbm %s2538_s0, 2048 }
   0x2   :  { %s14_s10 = sshll.u32 %s1620_s9, 4  ;;  %p1573_p0 = scmp.ne.s32.totalorder %s2538_s0, %s1572_s13  ;;  %s15_s10 = int_to_ptr.vmem [resolvable:$true] %s14_s10 }
   0x3   :  { %p1576_p1 = scmp.lt.u32.totalorder %s1572_s13, %s2538_s0 }
   0x5   :  { %p1578_p2 = pnand %p1576_p1, %p1573_p0 }
   0x7   :  { %1581 = shalt.err (!%p1578_p2)
}
   0x8   :  { %s1582_s18 = scalar_lea.vmem %s15_s10, 2048  ;;  %p1587_p4 = scmp.lt.s32.totalorder %s15_s10, %s15_s10 }
   0x9   :  { %p1583_p3 = scmp.ne.s32.totalorder %s15_s10, %s1582_s18  ;;  %p1588_p5 = scmp.lt.s32.totalorder %s1582_s18, %s1582_s18 }
   0xb   :  { %p1589_p6 = por %p1588_p5, %p1587_p4 }
   0xd   :  { %p1590_p7 = pnand %p1589_p6, %p1583_p3 }
   0xf   :  { %1593 = shalt.err (!%p1590_p7)
}
  0x10   :  { %s1621_s19 = smov 128   ;;  %s1622_s20 = smov 8  }
  0x11   :  { %20 = dma.hbm_to_vmem [thread:$0]  %s2538_s0, 2048, %s15_s10, [#allocation6], %s1621_s19, %s1621_s19, %s1622_s20  }
  0x12   :  { %s1623_s23 = smov [#allocation7]   ;;  %s1594_s27 = scalar_lea.hbm %s2539_s1, 2048 }
  0x13   :  { %s26_s24 = sshll.u32 %s1623_s23, 4  ;;  %p1595_p8 = scmp.ne.s32.totalorder %s2539_s1, %s1594_s27  ;;  %s27_s24 = int_to_ptr.vmem [resolvable:$true] %s26_s24 }
  0x14   :  { %p1598_p9 = scmp.lt.u32.totalorder %s1594_s27, %s2539_s1 }
  0x16   :  { %p1600_p10 = pnand %p1598_p9, %p1595_p8 }
  0x18   :  { %1603 = shalt.err (!%p1600_p10)
}
  0x19   :  { %s1604_s4 = scalar_lea.vmem %s27_s24, 2048  ;;  %p1609_p12 = scmp.lt.s32.totalorder %s27_s24, %s27_s24 }
  0x1a   :  { %p1605_p11 = scmp.ne.s32.totalorder %s27_s24, %s1604_s4  ;;  %p1610_p13 = scmp.lt.s32.totalorder %s1604_s4, %s1604_s4 }
  0x1c   :  { %p1611_p0 = por %p1610_p13, %p1609_p12 }
  0x1e   :  { %p1612_p1 = pnand %p1611_p0, %p1605_p11 }
  0x20   :  { %1615 = shalt.err (!%p1612_p1)
}
  0x21   :  { %32 = dma.hbm_to_vmem [thread:$0]  %s2539_s1, 2048, %s27_s24, [#allocation8], %s1621_s19, %s1621_s19, %s1622_s20  }
  0x22   :  { %1616 = dma.done.wait [#allocation6], 2048  }
  0x23   :  { %1617 = vsyncadd [#allocation6], 4294965248 }
  0x24   :  { %1618 = dma.done.wait [#allocation8], 2048  }
  0x25   :  { %1619 = vsyncadd [#allocation8], 4294965248  ;;  %vm2541_vm0 = vcmask 7168   ;;  %v1624_v0 = vmov 0.0   ;;  %v1758_v1 = vld [vmem:[#allocation7] sm:$0xff]  ;;  %v1760_v2 = vld [vmem:[#allocation7 + $0x10] sm:$0xff] }
  0x26   :  { %1260 = vst.msk [vmem:[%s2540_s2 + $0x8] sm:$0xff] %vm2541_vm0, %v1624_v0  ;;  %1261 = vst.msk [vmem:[%s2540_s2 + $0x10] sm:$0xff] %vm2541_vm0, %v1624_v0  ;;  %v1762_v3 = vld [vmem:[#allocation7 + $0x8] sm:$0xff]  ;;  %v236_v4 = vmul.f32 %v1758_v1, %v1758_v1  ;;  %v238_v5 = vmul.f32 %v1760_v2, %v1760_v2  ;;  %v1768_v6 = vld [vmem:[#allocation7 + $0x18] sm:$0xff] }
  0x27   :  { %1262 = vst.msk [vmem:[%s2540_s2 + $0x18] sm:$0xff] %vm2541_vm0, %v1624_v0  ;;  %1263 = vst.msk [vmem:[%s2540_s2 + $0x20] sm:$0xff] %vm2541_vm0, %v1624_v0  ;;  %v237_v7 = vmul.f32 %v1762_v3, %v1762_v3  ;;  %v239_v8 = vmul.f32 %v1768_v6, %v1768_v6  ;;  %v1774_v9 = vld [vmem:[#allocation7 + $0x28] sm:$0xff]  ;;  %v1776_v10 = vld [vmem:[#allocation7 + $0x20] sm:$0xff] }
  0x28   :  { %1264 = vst.msk [vmem:[%s2540_s2 + $0x28] sm:$0xff] %vm2541_vm0, %v1624_v0  ;;  %1265 = vst.msk [vmem:[%s2540_s2 + $0x30] sm:$0xff] %vm2541_vm0, %v1624_v0  ;;  %252 = vadd.xlane.f32.xlu0 %v236_v4  ;;  %256 = vadd.xlane.f32.xlu1 %v238_v5  ;;  %v241_v11 = vmul.f32 %v1774_v9, %v1774_v9  ;;  %v240_v12 = vmul.f32 %v1776_v10, %v1776_v10  ;;  %v1782_v13 = vld [vmem:[#allocation7 + $0x38] sm:$0xff]  ;;  %v1784_v14 = vld [vmem:[#allocation7 + $0x30] sm:$0xff] }
  0x29   :  { %1266 = vst.msk [vmem:[%s2540_s2 + $0x38] sm:$0xff] %vm2541_vm0, %v1624_v0  ;;  %1267 = vst.msk [vmem:[%s2540_s2 + $0x40] sm:$0xff] %vm2541_vm0, %v1624_v0  ;;  %v243_v15 = vmul.f32 %v1782_v13, %v1782_v13  ;;  %v242_v16 = vmul.f32 %v1784_v14, %v1784_v14  ;;  %v1790_v17 = vld [vmem:[#allocation7 + $0x48] sm:$0xff]  ;;  %v1792_v18 = vld [vmem:[#allocation7 + $0x40] sm:$0xff] }
  0x2a   :  { %1268 = vst.msk [vmem:[%s2540_s2 + $0x48] sm:$0xff] %vm2541_vm0, %v1624_v0  ;;  %1269 = vst.msk [vmem:[%s2540_s2 + $0x50] sm:$0xff] %vm2541_vm0, %v1624_v0  ;;  %v245_v19 = vmul.f32 %v1790_v17, %v1790_v17  ;;  %v244_v20 = vmul.f32 %v1792_v18, %v1792_v18  ;;  %v1798_v21 = vld [vmem:[#allocation7 + $0x58] sm:$0xff]  ;;  %v1800_v22 = vld [vmem:[#allocation7 + $0x50] sm:$0xff] }
  0x2b   :  { %1270 = vst.msk [vmem:[%s2540_s2 + $0x58] sm:$0xff] %vm2541_vm0, %v1624_v0  ;;  %1271 = vst.msk [vmem:[%s2540_s2 + $0x60] sm:$0xff] %vm2541_vm0, %v1624_v0  ;;  %v247_v23 = vmul.f32 %v1798_v21, %v1798_v21  ;;  %v246_v24 = vmul.f32 %v1800_v22, %v1800_v22  ;;  %v1806_v25 = vld [vmem:[#allocation7 + $0x68] sm:$0xff]  ;;  %v1808_v26 = vld [vmem:[#allocation7 + $0x60] sm:$0xff] }
  0x2c   :  { %1272 = vst.msk [vmem:[%s2540_s2 + $0x68] sm:$0xff] %vm2541_vm0, %v1624_v0  ;;  %1273 = vst.msk [vmem:[%s2540_s2 + $0x70] sm:$0xff] %vm2541_vm0, %v1624_v0  ;;  %254 = vadd.xlane.f32.xlu0 %v237_v7  ;;  %258 = vadd.xlane.f32.xlu1 %v239_v8  ;;  %v249_v27 = vmul.f32 %v1806_v25, %v1806_v25  ;;  %v248_v28 = vmul.f32 %v1808_v26, %v1808_v26  ;;  %v1814_v29 = vld [vmem:[#allocation7 + $0x78] sm:$0xff]  ;;  %v1816_v30 = vld [vmem:[#allocation7 + $0x70] sm:$0xff] }
  0x2d   :  { %1274 = vst.msk [vmem:[%s2540_s2 + $0x78] sm:$0xff] %vm2541_vm0, %v1624_v0  ;;  %60 = vst.msk [vmem:[#allocation3] sm:$0xff] %vm2541_vm0, %v1624_v0  ;;  %v251_v31 = vmul.f32 %v1814_v29, %v1814_v29  ;;  %v250_v32 = vmul.f32 %v1816_v30, %v1816_v30  ;;  %v1822_v33 = vld [vmem:[#allocation5] sm:$0xff]  ;;  %v1824_v34 = vld [vmem:[#allocation5 + $0x8] sm:$0xff] }
  0x2e   :  { %61 = vst.msk [vmem:[#allocation3 + $0x8] sm:$0xff] %vm2541_vm0, %v1624_v0  ;;  %62 = vst.msk [vmem:[#allocation3 + $0x10] sm:$0xff] %vm2541_vm0, %v1624_v0  ;;  %v124_v35 = vmul.f32 %v1822_v33, %v1822_v33  ;;  %v125_v36 = vmul.f32 %v1824_v34, %v1824_v34  ;;  %v1830_v37 = vld [vmem:[#allocation5 + $0x40] sm:$0xff]  ;;  %v1832_v38 = vld [vmem:[#allocation5 + $0x48] sm:$0xff] }
  0x2f   :  { %63 = vst.msk [vmem:[#allocation3 + $0x18] sm:$0xff] %vm2541_vm0, %v1624_v0  ;;  %64 = vst.msk [vmem:[#allocation3 + $0x20] sm:$0xff] %vm2541_vm0, %v1624_v0  ;;  %v132_v39 = vmul.f32 %v1830_v37, %v1830_v37  ;;  %v133_v40 = vmul.f32 %v1832_v38, %v1832_v38  ;;  %v1838_v41 = vld [vmem:[#allocation5 + $0x10] sm:$0xff]  ;;  %v1846_v45 = vld [vmem:[#allocation5 + $0x18] sm:$0xff] }
  0x30   :  { %65 = vst.msk [vmem:[#allocation3 + $0x28] sm:$0xff] %vm2541_vm0, %v1624_v0  ;;  %66 = vst.msk [vmem:[#allocation3 + $0x30] sm:$0xff] %vm2541_vm0, %v1624_v0  ;;  %262 = vadd.xlane.f32.xlu1 %v241_v11  ;;  %260 = vadd.xlane.f32.xlu0 %v240_v12  ;;  %v1840_v42 = vld [vmem:[#allocation5 + $0x50] sm:$0xff]  ;;  %v126_v43 = vmul.f32 %v1838_v41, %v1838_v41  ;;  %v1848_v46 = vld [vmem:[#allocation5 + $0x58] sm:$0xff]  ;;  %v127_v47 = vmul.f32 %v1846_v45, %v1846_v45 }
  0x31   :  { %67 = vst.msk [vmem:[#allocation3 + $0x38] sm:$0xff] %vm2541_vm0, %v1624_v0  ;;  %68 = vst.msk [vmem:[#allocation3 + $0x40] sm:$0xff] %vm2541_vm0, %v1624_v0  ;;  %v134_v44 = vmul.f32 %v1840_v42, %v1840_v42  ;;  %v135_v48 = vmul.f32 %v1848_v46, %v1848_v46  ;;  %v1854_v49 = vld [vmem:[#allocation5 + $0x20] sm:$0xff]  ;;  %v1862_v53 = vld [vmem:[#allocation5 + $0x28] sm:$0xff] }
  0x32   :  { %69 = vst.msk [vmem:[#allocation3 + $0x48] sm:$0xff] %vm2541_vm0, %v1624_v0  ;;  %70 = vst.msk [vmem:[#allocation3 + $0x50] sm:$0xff] %vm2541_vm0, %v1624_v0  ;;  %v1856_v50 = vld [vmem:[#allocation5 + $0x60] sm:$0xff]  ;;  %v128_v51 = vmul.f32 %v1854_v49, %v1854_v49  ;;  %v1864_v54 = vld [vmem:[#allocation5 + $0x68] sm:$0xff]  ;;  %v129_v55 = vmul.f32 %v1862_v53, %v1862_v53 }
  0x33   :  { %71 = vst.msk [vmem:[#allocation3 + $0x58] sm:$0xff] %vm2541_vm0, %v1624_v0  ;;  %72 = vst.msk [vmem:[#allocation3 + $0x60] sm:$0xff] %vm2541_vm0, %v1624_v0  ;;  %v136_v52 = vmul.f32 %v1856_v50, %v1856_v50  ;;  %v137_v56 = vmul.f32 %v1864_v54, %v1864_v54  ;;  %v1870_v57 = vld [vmem:[#allocation5 + $0x30] sm:$0xff]  ;;  %v1878_v61 = vld [vmem:[#allocation5 + $0x38] sm:$0xff] }
  0x34   :  { %73 = vst.msk [vmem:[#allocation3 + $0x68] sm:$0xff] %vm2541_vm0, %v1624_v0  ;;  %74 = vst.msk [vmem:[#allocation3 + $0x70] sm:$0xff] %vm2541_vm0, %v1624_v0  ;;  %266 = vadd.xlane.f32.xlu1 %v243_v15  ;;  %264 = vadd.xlane.f32.xlu0 %v242_v16  ;;  %v1872_v58 = vld [vmem:[#allocation5 + $0x70] sm:$0xff]  ;;  %v130_v59 = vmul.f32 %v1870_v57, %v1870_v57  ;;  %v1880_v62 = vld [vmem:[#allocation5 + $0x78] sm:$0xff]  ;;  %v131_v63 = vmul.f32 %v1878_v61, %v1878_v61 }
  0x35   :  { %75 = vst.msk [vmem:[#allocation3 + $0x78] sm:$0xff] %vm2541_vm0, %v1624_v0  ;;  %76 = vst.msk [vmem:[#allocation4] sm:$0xff] %vm2541_vm0, %v1624_v0  ;;  %v138_v60 = vmul.f32 %v1872_v58, %v1872_v58 }
  0x36   :  { %77 = vst.msk [vmem:[#allocation4 + $0x8] sm:$0xff] %vm2541_vm0, %v1624_v0  ;;  %78 = vst.msk [vmem:[#allocation4 + $0x10] sm:$0xff] %vm2541_vm0, %v1624_v0 }
  0x37   :  { %79 = vst.msk [vmem:[#allocation4 + $0x18] sm:$0xff] %vm2541_vm0, %v1624_v0  ;;  %80 = vst.msk [vmem:[#allocation4 + $0x20] sm:$0xff] %vm2541_vm0, %v1624_v0 }
  0x38   :  { %81 = vst.msk [vmem:[#allocation4 + $0x28] sm:$0xff] %vm2541_vm0, %v1624_v0  ;;  %82 = vst.msk [vmem:[#allocation4 + $0x30] sm:$0xff] %vm2541_vm0, %v1624_v0  ;;  %270 = vadd.xlane.f32.xlu1 %v245_v19  ;;  %268 = vadd.xlane.f32.xlu0 %v244_v20 }
  0x39   :  { %83 = vst.msk [vmem:[#allocation4 + $0x38] sm:$0xff] %vm2541_vm0, %v1624_v0  ;;  %84 = vst.msk [vmem:[#allocation4 + $0x40] sm:$0xff] %vm2541_vm0, %v1624_v0 }
  0x3a   :  { %85 = vst.msk [vmem:[#allocation4 + $0x48] sm:$0xff] %vm2541_vm0, %v1624_v0  ;;  %86 = vst.msk [vmem:[#allocation4 + $0x50] sm:$0xff] %vm2541_vm0, %v1624_v0 }
  0x3b   :  { %87 = vst.msk [vmem:[#allocation4 + $0x58] sm:$0xff] %vm2541_vm0, %v1624_v0  ;;  %88 = vst.msk [vmem:[#allocation4 + $0x60] sm:$0xff] %vm2541_vm0, %v1624_v0 }
  0x3c   :  { %89 = vst.msk [vmem:[#allocation4 + $0x68] sm:$0xff] %vm2541_vm0, %v1624_v0  ;;  %90 = vst.msk [vmem:[#allocation4 + $0x70] sm:$0xff] %vm2541_vm0, %v1624_v0  ;;  %274 = vadd.xlane.f32.xlu1 %v247_v23  ;;  %272 = vadd.xlane.f32.xlu0 %v246_v24 }
  0x3d   :  { %91 = vst.msk [vmem:[#allocation4 + $0x78] sm:$0xff] %vm2541_vm0, %v1624_v0  ;;  %v139_v0 = vmul.f32 %v1880_v62, %v1880_v62 }
  0x40   :  { %278 = vadd.xlane.f32.xlu1 %v249_v27  ;;  %276 = vadd.xlane.f32.xlu0 %v248_v28 }
  0x44   :  { %282 = vadd.xlane.f32.xlu1 %v251_v31  ;;  %280 = vadd.xlane.f32.xlu0 %v250_v32 }
  0x48   :  { %140 = vadd.xlane.f32.xlu0 %v124_v35  ;;  %142 = vadd.xlane.f32.xlu1 %v125_v36 }
  0x4c   :  { %156 = vadd.xlane.f32.xlu0 %v132_v39  ;;  %158 = vadd.xlane.f32.xlu1 %v133_v40 }
  0x50   :  { %144 = vadd.xlane.f32.xlu0 %v126_v43  ;;  %160 = vadd.xlane.f32.xlu1 %v134_v44 }
  0x54   :  { %146 = vadd.xlane.f32.xlu0 %v127_v47  ;;  %162 = vadd.xlane.f32.xlu1 %v135_v48 }
  0x58   :  { %148 = vadd.xlane.f32.xlu0 %v128_v51  ;;  %164 = vadd.xlane.f32.xlu1 %v136_v52 }
  0x5c   :  { %150 = vadd.xlane.f32.xlu0 %v129_v55  ;;  %166 = vadd.xlane.f32.xlu1 %v137_v56 }
  0x60   :  { %152 = vadd.xlane.f32.xlu0 %v130_v59  ;;  %168 = vadd.xlane.f32.xlu1 %v138_v60 }
  0x64   :  { %154 = vadd.xlane.f32.xlu0 %v131_v63  ;;  %170 = vadd.xlane.f32.xlu1 %v139_v0 }
  0xb5   :  { %v253_v4 = vpop.xlane.xlu0 %252  ;;  %v257_v5 = vpop.xlane.xlu1 %256 }
  0xb6   :  { %v284_v7 = vmax.f32 %v253_v4, 1e-16  ;;  %v286_v8 = vmax.f32 %v257_v5, 1e-16 }
  0xb8   :  { %1442 = vrsqrt.f32 %v286_v8 }
  0xb9   :  { %v255_v11 = vpop.xlane.xlu0 %254  ;;  %v259_v12 = vpop.xlane.xlu1 %258  ;;  %1444 = vrsqrt.f32 %v284_v7 }
  0xba   :  { %v285_v15 = vmax.f32 %v255_v11, 1e-16  ;;  %v287_v16 = vmax.f32 %v259_v12, 1e-16 }
  0xbc   :  { %1446 = vrsqrt.f32 %v285_v15 }
  0xbd   :  { %1448 = vrsqrt.f32 %v287_v16  ;;  %v263_v19 = vpop.xlane.xlu1 %262  ;;  %v261_v20 = vpop.xlane.xlu0 %260 }
  0xbe   :  { %v289_v23 = vmax.f32 %v263_v19, 1e-16  ;;  %v288_v24 = vmax.f32 %v261_v20, 1e-16 }
  0xc0   :  { %1450 = vrsqrt.f32 %v289_v23 }
  0xc1   :  { %1452 = vrsqrt.f32 %v288_v24  ;;  %v267_v27 = vpop.xlane.xlu1 %266  ;;  %v265_v28 = vpop.xlane.xlu0 %264 }
  0xc2   :  { %v1443_v31 = vpop.eup %1442  ;;  %v291_v32 = vmax.f32 %v267_v27, 1e-16  ;;  %v290_v36 = vmax.f32 %v265_v28, 1e-16 }
  0xc3   :  { %v1445_v35 = vpop.eup %1444  ;;  %v318_v44 = vmul.f32 %v1443_v31, %v1760_v2 }
  0xc4   :  { %v316_v48 = vmul.f32 %v1445_v35, %v1758_v1  ;;  %1454 = vrsqrt.f32 %v291_v32 }
  0xc5   :  { %v271_v39 = vpop.xlane.xlu1 %270  ;;  %v269_v40 = vpop.xlane.xlu0 %268  ;;  %1456 = vrsqrt.f32 %v290_v36 }
  0xc6   :  { %v1447_v43 = vpop.eup %1446  ;;  %v293_v4 = vmax.f32 %v271_v39, 1e-16  ;;  %v292_v2 = vmax.f32 %v269_v40, 1e-16 }
  0xc7   :  { %v1449_v47 = vpop.eup %1448  ;;  %v317_v51 = vmul.f32 %v1447_v43, %v1762_v3 }
  0xc8   :  { %v319_v52 = vmul.f32 %v1449_v47, %v1768_v6  ;;  %1458 = vrsqrt.f32 %v293_v4 }
  0xc9   :  { %v1385_v55 = vpack.c.bf16 %v317_v51, %v316_v48  ;;  %v275_v56 = vpop.xlane.xlu1 %274  ;;  %v273_v59 = vpop.xlane.xlu0 %272  ;;  %1460 = vrsqrt.f32 %v292_v2 }
  0xca   :  { %v1451_v60 = vpop.eup %1450  ;;  %v1389_v63 = vpack.c.bf16 %v319_v52, %v318_v44  ;;  %v295_v16 = vmax.f32 %v275_v56, 1e-16  ;;  %v294_v19 = vmax.f32 %v273_v59, 1e-16 }
  0xcb   :  { %v1453_v0 = vpop.eup %1452  ;;  %1386 = vmatprep.subr.bf16.mxu0 %v1385_v55  ;;  %1417 = vmatprep.subr.bf16.mxu1 %v1385_v55  ;;  %v321_v3 = vmul.f32 %v1451_v60, %v1774_v9 }
  0xcc   :  { %1388 = vmatpush3.bf16.xpose.msra.mxu0 %v1385_v55  ;;  %1425 = vmatpush3.bf16.xpose.msra.mxu1 %v1385_v55  ;;  %v320_v1 = vmul.f32 %v1453_v0, %v1776_v10  ;;  %1462 = vrsqrt.f32 %v295_v16 }
  0xcd   :  { %1390 = vmatprep.subr.bf16.mxu0 %v1389_v63  ;;  %1418 = vmatprep.subr.bf16.mxu1 %v1389_v63  ;;  %v279_v6 = vpop.xlane.xlu1 %278  ;;  %v277_v5 = vpop.xlane.xlu0 %276  ;;  %1464 = vrsqrt.f32 %v294_v19 }
  0xce   :  { %v1455_v7 = vpop.eup %1454  ;;  %v1393_v8 = vpack.c.bf16 %v321_v3, %v320_v1  ;;  %v297_v39 = vmax.f32 %v279_v6, 1e-16 }
  0xcf   :  { %v1457_v15 = vpop.eup %1456  ;;  %v323_v10 = vmul.f32 %v1455_v7, %v1782_v13 }
  0xd0   :  { %v322_v20 = vmul.f32 %v1457_v15, %v1784_v14  ;;  %v296_v14 = vmax.f32 %v277_v5, 1e-16 }
  0xd1   :  { %v283_v11 = vpop.xlane.xlu1 %282  ;;  %v281_v12 = vpop.xlane.xlu0 %280 }
  0xd2   :  { %v1459_v27 = vpop.eup %1458  ;;  %v1397_v28 = vpack.c.bf16 %v323_v10, %v322_v20  ;;  %v299_v56 = vmax.f32 %v283_v11, 1e-16 }
  0xd3   :  { %v1461_v35 = vpop.eup %1460  ;;  %v325_v40 = vmul.f32 %v1459_v27, %v1790_v17 }
  0xd4   :  { %1392 = vmatpush3.bf16.xpose.msra.mxu0 %v1389_v63  ;;  %1426 = vmatpush3.bf16.xpose.msra.mxu1 %v1389_v63  ;;  %v324_v13 = vmul.f32 %v1461_v35, %v1792_v18  ;;  %v298_v63 = vmax.f32 %v281_v12, 1e-16 }
  0xd5   :  { %1394 = vmatprep.subr.bf16.mxu0 %v1393_v8  ;;  %1419 = vmatprep.subr.bf16.mxu1 %v1393_v8  ;;  %v141_v9 = vpop.xlane.xlu0 %140  ;;  %v1894_v23 = vpop.xlane.xlu1 %142 }
  0xd6   :  { %v172_v24 = vmax.f32 %v141_v9, 1e-16  ;;  %v1463_v47 = vpop.eup %1462  ;;  %v1401_v51 = vpack.c.bf16 %v325_v40, %v324_v13  ;;  %v173_v12 = vmax.f32 %v1894_v23, 1e-16 }
  0xd7   :  { %v1465_v48 = vpop.eup %1464  ;;  %v327_v17 = vmul.f32 %v1463_v47, %v1798_v21 }
  0xd8   :  { %1466 = vrsqrt.f32 %v172_v24  ;;  %v326_v18 = vmul.f32 %v1465_v48, %v1800_v22 }
  0xd9   :  { %v157_v31 = vpop.xlane.xlu0 %156  ;;  %v1896_v32 = vpop.xlane.xlu1 %158 }
  0xda   :  { %v180_v36 = vmax.f32 %v157_v31, 1e-16  ;;  %v1405_v6 = vpack.c.bf16 %v327_v17, %v326_v18  ;;  %v181_v19 = vmax.f32 %v1896_v32, 1e-16 }
  0xdc   :  { %1396 = vmatpush3.bf16.xpose.msra.mxu0 %v1393_v8  ;;  %1427 = vmatpush3.bf16.xpose.msra.mxu1 %v1393_v8  ;;  %1468 = vrsqrt.f32 %v180_v36 }
  0xdd   :  { %1398 = vmatprep.subr.bf16.mxu0 %v1397_v28  ;;  %1420 = vmatprep.subr.bf16.mxu1 %v1397_v28  ;;  %v145_v43 = vpop.xlane.xlu0 %144  ;;  %v161_v44 = vpop.xlane.xlu1 %160  ;;  %1470 = vrsqrt.f32 %v297_v39 }
  0xde   :  { %1472 = vrsqrt.f32 %v296_v14  ;;  %v182_v10 = vmax.f32 %v161_v44, 1e-16 }
  0xdf   :  { %1474 = vrsqrt.f32 %v299_v56 }
  0xe0   :  { %1476 = vrsqrt.f32 %v298_v63 }
  0xe1   :  { %v147_v55 = vpop.xlane.xlu0 %146  ;;  %v163_v59 = vpop.xlane.xlu1 %162  ;;  %1478 = vrsqrt.f32 %v173_v12 }
  0xe2   :  { %v1467_v52 = vpop.eup %1466  ;;  %v175_v9 = vmax.f32 %v147_v55, 1e-16  ;;  %1480 = vrsqrt.f32 %v181_v19  ;;  %v183_v23 = vmax.f32 %v163_v59, 1e-16 }
  0xe3   :  { %v204_v60 = vmul.f32 2.0, %v1467_v52 }
  0xe4   :  { %1400 = vmatpush3.bf16.xpose.msra.mxu0 %v1397_v28  ;;  %1428 = vmatpush3.bf16.xpose.msra.mxu1 %v1397_v28 }
  0xe5   :  { %1402 = vmatprep.subr.bf16.mxu0 %v1401_v51  ;;  %1421 = vmatprep.subr.bf16.mxu1 %v1401_v51  ;;  %v220_v0 = vmul.f32 %v204_v60, %v1822_v33  ;;  %v149_v1 = vpop.xlane.xlu0 %148  ;;  %v165_v5 = vpop.xlane.xlu1 %164 }
  0xe6   :  { %v1469_v4 = vpop.eup %1468  ;;  %v176_v28 = vmax.f32 %v149_v1, 1e-16  ;;  %v184_v31 = vmax.f32 %v165_v5, 1e-16 }
  0xe7   :  { %1361 = vmatprep.mubr.f32.mxu0 %v220_v0  ;;  %v212_v2 = vmul.f32 2.0, %v1469_v4  ;;  %v1471_v3 = vpop.eup %1470 }
  0xe8   :  { %v1473_v8 = vpop.eup %1472  ;;  %v329_v22 = vmul.f32 %v1471_v3, %v1806_v25 }
  0xe9   :  { %v228_v7 = vmul.f32 %v212_v2, %v1830_v37  ;;  %v328_v21 = vmul.f32 %v1473_v8, %v1808_v26  ;;  %v151_v33 = vpop.xlane.xlu0 %150  ;;  %v167_v11 = vpop.xlane.xlu1 %166  ;;  %v174_v37 = vmax.f32 %v145_v43, 1e-16 }
  0xea   :  { %v1475_v15 = vpop.eup %1474  ;;  %v177_v32 = vmax.f32 %v151_v33, 1e-16  ;;  %v185_v36 = vmax.f32 %v167_v11, 1e-16 }
  0xeb   :  { %1373 = vmatprep.mubr.f32.mxu1 %v228_v7  ;;  %v1409_v16 = vpack.c.bf16 %v329_v22, %v328_v21  ;;  %v1477_v20 = vpop.eup %1476  ;;  %v331_v26 = vmul.f32 %v1475_v15, %v1814_v29  ;;  %1482 = vrsqrt.f32 %v174_v37 }
  0xec   :  { %1404 = vmatpush3.bf16.xpose.msra.mxu0 %v1401_v51  ;;  %1429 = vmatpush3.bf16.xpose.msra.mxu1 %v1401_v51  ;;  %v330_v25 = vmul.f32 %v1477_v20, %v1816_v30  ;;  %1484 = vrsqrt.f32 %v182_v10  ;;  %v1479_v30 = vpop.eup %1478 }
  0xed   :  { %1406 = vmatprep.subr.bf16.mxu0 %v1405_v6  ;;  %1422 = vmatprep.subr.bf16.mxu1 %v1405_v6  ;;  %v153_v24 = vpop.xlane.xlu0 %152  ;;  %v169_v27 = vpop.xlane.xlu1 %168  ;;  %1486 = vrsqrt.f32 %v175_v9  ;;  %v205_v55 = vmul.f32 2.0, %v1479_v30 }
  0xee   :  { %v1413_v35 = vpack.c.bf16 %v331_v26, %v330_v25  ;;  %1488 = vrsqrt.f32 %v183_v23  ;;  %v178_v39 = vmax.f32 %v153_v24, 1e-16  ;;  %v186_v13 = vmax.f32 %v169_v27, 1e-16  ;;  %v1481_v44 = vpop.eup %1480 }
  0xef   :  { %1490 = vrsqrt.f32 %v176_v28  ;;  %v213_v56 = vmul.f32 2.0, %v1481_v44  ;;  %v221_v1 = vmul.f32 %v205_v55, %v1824_v34  ;;  %v478_v24 = vlaneseq }
  0xf0   :  { %1492 = vrsqrt.f32 %v184_v31 }
  0xf1   :  { %v155_v14 = vpop.xlane.xlu0 %154  ;;  %v171_v40 = vpop.xlane.xlu1 %170  ;;  %1494 = vrsqrt.f32 %v177_v32  ;;  %v229_v3 = vmul.f32 %v213_v56, %v1832_v38  ;;  %v1931_v25 = vand.u32 127, %v478_v24 }
  0xf2   :  { %1496 = vrsqrt.f32 %v185_v36  ;;  %v179_v29 = vmax.f32 %v155_v14, 1e-16  ;;  %v187_v43 = vmax.f32 %v171_v40, 1e-16 }
  0xf3   :  { %1498 = vrsqrt.f32 %v178_v39  ;;  %vm533_vm14 = vcmp.ge.s32.totalorder %v1931_v25, 8 }
  0xf4   :  { %1408 = vmatpush3.bf16.xpose.msra.mxu0 %v1405_v6  ;;  %1430 = vmatpush3.bf16.xpose.msra.mxu1 %v1405_v6  ;;  %1500 = vrsqrt.f32 %v186_v13 }
  0xf5   :  { %1410 = vmatprep.subr.bf16.mxu0 %v1409_v16  ;;  %1423 = vmatprep.subr.bf16.mxu1 %v1409_v16  ;;  %v1483_v47 = vpop.eup %1482  ;;  %1502 = vrsqrt.f32 %v179_v29 }
  0xf6   :  { %v1485_v48 = vpop.eup %1484  ;;  %1504 = vrsqrt.f32 %v187_v43  ;;  %v206_v60 = vmul.f32 2.0, %v1483_v47 }
  0xf7   :  { %v1487_v51 = vpop.eup %1486  ;;  %v214_v63 = vmul.f32 2.0, %v1485_v48 }
  0xf8   :  { %v1489_v52 = vpop.eup %1488  ;;  %v207_v4 = vmul.f32 2.0, %v1487_v51  ;;  %v222_v8 = vmul.f32 %v206_v60, %v1838_v41 }
  0xf9   :  { %v1491_v59 = vpop.eup %1490  ;;  %v215_v2 = vmul.f32 2.0, %v1489_v52  ;;  %v230_v21 = vmul.f32 %v214_v63, %v1840_v42 }
  0xfa   :  { %v1493_v18 = vpop.eup %1492  ;;  %v208_v5 = vmul.f32 2.0, %v1491_v59  ;;  %v223_v15 = vmul.f32 %v207_v4, %v1846_v45 }
  0xfb   :  { %v1495_v17 = vpop.eup %1494  ;;  %v216_v7 = vmul.f32 2.0, %v1493_v18 }
  0xfc   :  { %1412 = vmatpush3.bf16.xpose.msra.mxu0 %v1409_v16  ;;  %1431 = vmatpush3.bf16.xpose.msra.mxu1 %v1409_v16  ;;  %v1497_v0 = vpop.eup %1496  ;;  %v209_v11 = vmul.f32 2.0, %v1495_v17  ;;  %v231_v16 = vmul.f32 %v215_v2, %v1848_v46  ;;  %v224_v20 = vmul.f32 %v208_v5, %v1854_v49 }
  0xfd   :  { %1414 = vmatprep.subr.bf16.mxu0 %v1413_v35  ;;  %1424 = vmatprep.subr.bf16.mxu1 %v1413_v35  ;;  %v1499_v6 = vpop.eup %1498  ;;  %v217_v12 = vmul.f32 2.0, %v1497_v0  ;;  %v232_v41 = vmul.f32 %v216_v7, %v1856_v50 }
  0xfe   :  { %v1501_v22 = vpop.eup %1500  ;;  %v210_v19 = vmul.f32 2.0, %v1499_v6  ;;  %v225_v10 = vmul.f32 %v209_v11, %v1862_v53  ;;  %v1924_v53 = vshrl.u32 %v478_v24, 7 }
  0xff   :  { %v1503_v33 = vpop.eup %1502  ;;  %v218_v38 = vmul.f32 2.0, %v1501_v22  ;;  %v233_v9 = vmul.f32 %v217_v12, %v1864_v54 }
 0x100   :  { %v1505_v34 = vpop.eup %1504  ;;  %v211_v42 = vmul.f32 2.0, %v1503_v33  ;;  %v226_v45 = vmul.f32 %v210_v19, %v1870_v57  ;;  %v1927_v54 = vadd.s32 8, %v1924_v53  ;;  %v936_v57 = vadd.s32 4, %v1924_v53 }
 0x101   :  { %v219_v37 = vmul.f32 2.0, %v1505_v34  ;;  %v234_v46 = vmul.f32 %v218_v38, %v1872_v58  ;;  %v1955_v36 = vadd.s32 16, %v1924_v53  ;;  %v1972_v30 = vadd.s32 88, %v1924_v53 }
 0x102   :  { %v227_v49 = vmul.f32 %v211_v42, %v1878_v61  ;;  %v937_v58 = vadd.s32 4, %v1927_v54  ;;  %v1934_v61 = vadd.s32 72, %v1924_v53  ;;  %v1281_v26 = vadd.s32 4294967288, %v936_v57 }
 0x103   :  { %v235_v50 = vmul.f32 %v219_v37, %v1880_v62  ;;  %v1937_v62 = vadd.s32 64, %v1924_v53  ;;  %vm952_vm1 = vcmp.ge.s32.totalorder %v936_v57, 8  ;;  %v938_v14 = vadd.s32 4, %v1955_v36 }
 0x104   :  { %1416 = vmatpush3.bf16.xpose.msra.mxu0 %v1413_v35  ;;  %1432 = vmatpush3.bf16.xpose.msra.mxu1 %v1413_v35  ;;  %v1939_v23 = vadd.s32 4294967288, %v937_v58  ;;  %v1941_v27 = vsel %vm952_vm1, %v1281_v26, %v936_v57  ;;  %v945_v32 = vadd.s32 4, %v1934_v61  ;;  %v1952_v35 = vadd.s32 24, %v1924_v53 }
 0x105   :  { %v944_v28 = vadd.s32 4, %v1937_v62  ;;  %vm1000_vm3 = vcmp.eq.s32.totalorder %v1931_v25, %v1941_v27  ;;  %v1964_v13 = vadd.s32 4294967288, %v938_v14  ;;  %v1975_v43 = vadd.s32 80, %v1924_v53 }
 0x106   :  { %vm1001_vm2 = vcmp.eq.s32.totalorder %v1931_v25, %v1939_v23  ;;  %v1959_v39 = vadd.s32 4294967288, %v945_v32  ;;  %v939_v40 = vadd.s32 4, %v1952_v35  ;;  %v947_v47 = vadd.s32 4, %v1972_v30 }
 0x107   :  { %v1948_v31 = vadd.s32 4294967288, %v944_v28  ;;  %vm1002_vm6 = vcmp.eq.s32.totalorder %v1931_v25, %v1964_v13  ;;  %v946_v44 = vadd.s32 4, %v1975_v43  ;;  %v1982_v48 = vadd.s32 32, %v1924_v53 }
 0x108   :  { %vm1009_vm5 = vcmp.eq.s32.totalorder %v1931_v25, %v1959_v39  ;;  %v1969_v29 = vadd.s32 4294967288, %v939_v40  ;;  %v1986_v52 = vadd.s32 4294967288, %v947_v47  ;;  %v1989_v55 = vadd.s32 40, %v1924_v53 }
 0x109   :  { %vm1008_vm4 = vcmp.eq.s32.totalorder %v1931_v25, %v1948_v31  ;;  %v1984_v51 = vadd.s32 4294967288, %v946_v44  ;;  %v940_v56 = vadd.s32 4, %v1982_v48  ;;  %v2004_v18 = vadd.s32 96, %v1924_v53 }
 0x10a   :  { %vm1003_vm7 = vcmp.eq.s32.totalorder %v1931_v25, %v1969_v29  ;;  %v941_v60 = vadd.s32 4, %v1989_v55  ;;  %v2009_v17 = vadd.s32 104, %v1924_v53  ;;  %v2014_v2 = vadd.s32 48, %v1924_v53 }
 0x10b   :  { %1362 = vmatmul.mubr.f32.vlgmr.msra.gmra.mrb[0].mxu0 %v221_v1  ;;  %1374 = vmatmul.mubr.f32.vlgmr.msra.gmra.mrb[0].mxu1 %v229_v3  ;;  %vm1010_vm8 = vcmp.eq.s32.totalorder %v1931_v25, %v1984_v51  ;;  %v1996_v59 = vadd.s32 4294967288, %v940_v56  ;;  %v948_v0 = vadd.s32 4, %v2004_v18  ;;  %v2021_v6 = vadd.s32 56, %v1924_v53 }
 0x10c   :  { %1364 = vmatprep.mubr.f32.mxu0 %v222_v8  ;;  %1376 = vmatprep.mubr.f32.mxu1 %v230_v21  ;;  %v2001_v63 = vadd.s32 4294967288, %v941_v60  ;;  %v949_v4 = vadd.s32 4, %v2009_v17  ;;  %v942_v5 = vadd.s32 4, %v2014_v2  ;;  %v1625_v21 = vmov -1e+30  }
 0x10d   :  { %v2016_v1 = vadd.s32 4294967288, %v948_v0  ;;  %v943_v8 = vadd.s32 4, %v2021_v6  ;;  %45 = vst.msk [vmem:[#allocation2 + $0x8] sm:$0xff] %vm2541_vm0, %v1625_v21  ;;  %44 = vst.msk [vmem:[#allocation2] sm:$0xff] %vm2541_vm0, %v1625_v21  ;;  %v2052_v33 = vadd.s32 112, %v1924_v53  ;;  %v2057_v11 = vadd.s32 120, %v1924_v53 }
 0x10e   :  { %v2018_v3 = vadd.s32 4294967288, %v949_v4  ;;  %v2028_v7 = vadd.s32 4294967288, %v942_v5  ;;  %46 = vst.msk [vmem:[#allocation2 + $0x10] sm:$0xff] %vm2541_vm0, %v1625_v21  ;;  %47 = vst.msk [vmem:[#allocation2 + $0x18] sm:$0xff] %vm2541_vm0, %v1625_v21  ;;  %vm518_vm15 = vcmp.eq.s32.totalorder %v1931_v25, %v1927_v54  ;;  %vm517_vm13 = vcmp.eq.s32.totalorder %v1931_v25, %v1924_v53 }
 0x10f   :  { %1365 = vmatmul.mubr.f32.gmra.mrb[2].mxu0 %v223_v15  ;;  %1377 = vmatmul.mubr.f32.gmra.mrb[2].mxu1 %v231_v16  ;;  %48 = vst.msk [vmem:[#allocation2 + $0x20] sm:$0xff] %vm2541_vm0, %v1625_v21  ;;  %49 = vst.msk [vmem:[#allocation2 + $0x28] sm:$0xff] %vm2541_vm0, %v1625_v21  ;;  %v2049_v22 = vadd.s32 4294967288, %v943_v8  ;;  %v950_v12 = vadd.s32 4, %v2052_v33  ;;  %v951_v15 = vadd.s32 4, %v2057_v11  ;;  %vm526_vm11 = vcmp.eq.s32.totalorder %v1931_v25, %v1934_v61 }
 0x110   :  { %1367 = vmatprep.mubr.f32.mxu0 %v224_v20  ;;  %1379 = vmatprep.mubr.f32.mxu1 %v232_v41  ;;  %50 = vst.msk [vmem:[#allocation2 + $0x30] sm:$0xff] %vm2541_vm0, %v1625_v21  ;;  %51 = vst.msk [vmem:[#allocation2 + $0x38] sm:$0xff] %vm2541_vm0, %v1625_v21  ;;  %vm525_vm1 = vcmp.eq.s32.totalorder %v1931_v25, %v1937_v62  ;;  %v1626_v60 = vmov 0  }
 0x111   :  { %52 = vst.msk [vmem:[#allocation2 + $0x40] sm:$0xff] %vm2541_vm0, %v1625_v21  ;;  %53 = vst.msk [vmem:[#allocation2 + $0x48] sm:$0xff] %vm2541_vm0, %v1625_v21  ;;  %v2061_v16 = vadd.s32 4294967288, %v950_v12  ;;  %v2063_v34 = vadd.s32 4294967288, %v951_v15  ;;  %1440 = vset.pattern.permute.xlu1 %v1626_v60  ;;  %1441 = vset.pattern.permute.xlu0 %v1626_v60 }
 0x112   :  { %54 = vst.msk [vmem:[#allocation2 + $0x50] sm:$0xff] %vm2541_vm0, %v1625_v21  ;;  %55 = vst.msk [vmem:[#allocation2 + $0x58] sm:$0xff] %vm2541_vm0, %v1625_v21 }
 0x113   :  { %1368 = vmatmul.mubr.f32.gmra.mrb[4].mxu0 %v225_v10  ;;  %1380 = vmatmul.mubr.f32.gmra.mrb[4].mxu1 %v233_v9  ;;  %56 = vst.msk [vmem:[#allocation2 + $0x60] sm:$0xff] %vm2541_vm0, %v1625_v21  ;;  %57 = vst.msk [vmem:[#allocation2 + $0x68] sm:$0xff] %vm2541_vm0, %v1625_v21 }
 0x114   :  { %1370 = vmatprep.mubr.f32.mxu0 %v226_v45  ;;  %1382 = vmatprep.mubr.f32.mxu1 %v234_v46  ;;  %58 = vst.msk [vmem:[#allocation2 + $0x70] sm:$0xff] %vm2541_vm0, %v1625_v21  ;;  %59 = vst.msk [vmem:[#allocation2 + $0x78] sm:$0xff] %vm2541_vm0, %v1625_v21 }
 0x115   :  { %vm535_vm12 = vmor %vm518_vm15, %vm533_vm14  ;;  %vm520_vm15 = vcmp.eq.s32.totalorder %v1931_v25, %v1952_v35 }
 0x116   :  { %vm534_vm0 = vmor %vm517_vm13, %vm533_vm14  ;;  %vm519_vm13 = vcmp.eq.s32.totalorder %v1931_v25, %v1955_v36 }
 0x117   :  { %1371 = vmatmul.mubr.f32.gmra.mrb[6].mxu0 %v227_v49  ;;  %1383 = vmatmul.mubr.f32.gmra.mrb[6].mxu1 %v235_v50  ;;  %vm543_vm10 = vmor %vm526_vm11, %vm533_vm14  ;;  %vm2548_vm11 = vcmp.eq.s32.totalorder %v1931_v25, %v2016_v1  ;;  %v2262_v1 = vld [vmem:[#allocation2 + $0x8] sm:$0xff] }
 0x118   :  { %vm542_vm9 = vmor %vm525_vm1, %vm533_vm14  ;;  %vm2550_vm1 = vcmp.eq.s32.totalorder %v1931_v25, %v2018_v3  ;;  %v2264_v3 = vld [vmem:[#allocation2] sm:$0xff]  ;;  %v2272_v8 = vld [vmem:[#allocation2 + $0x48] sm:$0xff] }
 0x1de   :  { %v1363_v19 = vpop.f32.mrb[0].mxu0  ;;  %v1375_v38 = vpop.f32.mrb[0].mxu1 }
 0x1df   :  { %v398_v20 = vpop.f32.mrb[1].mxu0  ;;  %v2084_v41 = vsel %vm535_vm12, -1e+30, %v1363_v19  ;;  %v438_v42 = vpop.f32.mrb[1].mxu1  ;;  %v2106_v45 = vsel %vm543_vm10, -1e+30, %v1375_v38  ;;  %vm2547_vm10 = vcmp.eq.s32.totalorder %v1931_v25, %v1996_v59  ;;  %vm2549_vm12 = vcmp.eq.s32.totalorder %v1931_v25, %v2001_v63 }
 0x1e0   :  { %584 = vmax.xlane.f32.xlu1 %v2084_v41  ;;  %v2091_v37 = vsel %vm534_vm0, -1e+30, %v398_v20  ;;  %v2098_v10 = vsel %vm1000_vm3, %v398_v20, 0.0  ;;  %v2103_v9 = vsel %vm1008_vm4, %v438_v42, 0.0  ;;  %v2111_v46 = vsel %vm1001_vm2, %v1363_v19, 0.0  ;;  %vm537_vm0 = vmor %vm520_vm15, %vm533_vm14  ;;  %v2367_v20 = vld [vmem:[#allocation2 + $0x38] sm:$0xff] }
 0x1e1   :  { %582 = vmax.xlane.f32.xlu0 %v2091_v37  ;;  %v2116_v49 = vsel %vm1009_vm5, %v1375_v38, 0.0  ;;  %v2118_v50 = vsel %vm542_vm9, -1e+30, %v438_v42  ;;  %vm536_vm3 = vmor %vm519_vm13, %vm533_vm14  ;;  %vm528_vm2 = vcmp.eq.s32.totalorder %v1931_v25, %v1972_v30  ;;  %vm527_vm4 = vcmp.eq.s32.totalorder %v1931_v25, %v1975_v43  ;;  %v2298_v38 = vld [vmem:[#allocation2 + $0x10] sm:$0xff]  ;;  %2568 = vst [vmem:[#allocation14_spill] sm:$0xff] %v2367_v20  ;;  %v2387_v19 = vld [vmem:[#allocation2 + $0x78] sm:$0xff] }
 0x1e2   :  { %v1366_v24 = vpop.f32.mrb[2].mxu0  ;;  %v1378_v53 = vpop.f32.mrb[2].mxu1  ;;  %vm2546_vm5 = vcmp.eq.s32.totalorder %v1931_v25, %v1986_v52  ;;  %vm522_vm9 = vcmp.eq.s32.totalorder %v1931_v25, %v1989_v55  ;;  %vm530_vm13 = vcmp.eq.s32.totalorder %v1931_v25, %v2009_v17 }
 0x1e3   :  { %v408_v54 = vpop.f32.mrb[3].mxu0  ;;  %v448_v57 = vpop.f32.mrb[3].mxu1  ;;  %v2140_v62 = vsel %vm537_vm0, -1e+30, %v1366_v24  ;;  %v2145_v26 = vsel %vm1003_vm7, %v1366_v24, 0.0  ;;  %v2150_v23 = vsel %vm2546_vm5, %v1378_v53, 0.0  ;;  %vm521_vm7 = vcmp.eq.s32.totalorder %v1931_v25, %v1982_v48  ;;  %vm539_vm15 = vmor %vm522_vm9, %vm533_vm14 }
 0x1e4   :  { %600 = vmax.xlane.f32.xlu1 %v2106_v45  ;;  %v2132_v58 = vsel %vm1002_vm6, %v408_v54, 0.0  ;;  %v2137_v61 = vsel %vm1010_vm8, %v448_v57, 0.0  ;;  %v2152_v27 = vsel %vm536_vm3, -1e+30, %v408_v54  ;;  %vm545_vm6 = vmor %vm528_vm2, %vm533_vm14  ;;  %vm529_vm3 = vcmp.eq.s32.totalorder %v1931_v25, %v2004_v18 }
 0x1e5   :  { %598 = vmax.xlane.f32.xlu0 %v2118_v50  ;;  %vm544_vm8 = vmor %vm527_vm4, %vm533_vm14  ;;  %v2174_v14 = vsel %vm545_vm6, -1e+30, %v1378_v53  ;;  %vm2551_vm2 = vcmp.eq.s32.totalorder %v1931_v25, %v2028_v7  ;;  %vm2552_vm4 = vcmp.eq.s32.totalorder %v1931_v25, %v2049_v22  ;;  %vm2553_vm5 = vcmp.eq.s32.totalorder %v1931_v25, %v2061_v16  ;;  %v2279_v22 = vld [vmem:[#allocation2 + $0x40] sm:$0xff] }
 0x1e6   :  { %v1369_v28 = vpop.f32.mrb[4].mxu0  ;;  %v1381_v31 = vpop.f32.mrb[4].mxu1  ;;  %v2186_v29 = vsel %vm544_vm8, -1e+30, %v448_v57  ;;  %vm538_vm0 = vmor %vm521_vm7, %vm533_vm14  ;;  %vm2554_vm6 = vcmp.eq.s32.totalorder %v1931_v25, %v2063_v34  ;;  %vm524_vm9 = vcmp.eq.s32.totalorder %v1931_v25, %v2021_v6  ;;  %v2291_v34 = vld [vmem:[#allocation2 + $0x18] sm:$0xff] }
 0x1e7   :  { %v418_v32 = vpop.f32.mrb[5].mxu0  ;;  %v458_v35 = vpop.f32.mrb[5].mxu1  ;;  %v2179_v13 = vsel %vm2549_vm12, %v1369_v28, 0.0  ;;  %v2184_v40 = vsel %vm2550_vm1, %v1381_v31, 0.0  ;;  %v2208_v52 = vsel %vm539_vm15, -1e+30, %v1369_v28  ;;  %vm547_vm8 = vmor %vm530_vm13, %vm533_vm14  ;;  %vm532_vm12 = vcmp.eq.s32.totalorder %v1931_v25, %v2057_v11 }
 0x1e8   :  { %588 = vmax.xlane.f32.xlu1 %v2140_v62  ;;  %v2166_v36 = vsel %vm2547_vm10, %v418_v32, 0.0  ;;  %v2171_v39 = vsel %vm2548_vm11, %v458_v35, 0.0  ;;  %v2222_v59 = vsel %vm538_vm0, -1e+30, %v418_v32  ;;  %vm546_vm7 = vmor %vm529_vm3, %vm533_vm14  ;;  %vm523_vm10 = vcmp.eq.s32.totalorder %v1931_v25, %v2014_v2  ;;  %v2311_v57 = vld [vmem:[#allocation2 + $0x58] sm:$0xff] }
 0x1e9   :  { %586 = vmax.xlane.f32.xlu0 %v2152_v27  ;;  %v2231_v63 = vsel %vm547_vm8, -1e+30, %v1381_v31  ;;  %vm541_vm11 = vmor %vm524_vm9, %vm533_vm14  ;;  %v2236_v18 = vsel %vm546_vm7, -1e+30, %v458_v35  ;;  %vm531_vm15 = vcmp.eq.s32.totalorder %v1931_v25, %v2052_v33  ;;  %v2318_v31 = vld [vmem:[#allocation2 + $0x50] sm:$0xff] }
 0x1ea   :  { %v1372_v30 = vpop.f32.mrb[6].mxu0  ;;  %v1384_v43 = vpop.f32.mrb[6].mxu1  ;;  %vm540_vm1 = vmor %vm523_vm10, %vm533_vm14 }
 0x1eb   :  { %v428_v44 = vpop.f32.mrb[7].mxu0  ;;  %v468_v47 = vpop.f32.mrb[7].mxu1  ;;  %v2205_v51 = vsel %vm2552_vm4, %v1372_v30, 0.0  ;;  %v2218_v56 = vsel %vm2554_vm6, %v1384_v43, 0.0  ;;  %v2245_v17 = vsel %vm541_vm11, -1e+30, %v1372_v30  ;;  %vm549_vm13 = vmor %vm532_vm12, %vm533_vm14 }
 0x1ec   :  { %604 = vmax.xlane.f32.xlu1 %v2174_v14  ;;  %v2200_v48 = vsel %vm2551_vm2, %v428_v44, 0.0  ;;  %v2213_v55 = vsel %vm2553_vm5, %v468_v47, 0.0  ;;  %v2250_v0 = vsel %vm540_vm1, -1e+30, %v428_v44  ;;  %vm548_vm0 = vmor %vm531_vm15, %vm533_vm14  ;;  %v2255_v4 = vsel %vm549_vm13, -1e+30, %v1384_v43 }
 0x1ed   :  { %602 = vmax.xlane.f32.xlu0 %v2186_v29  ;;  %v2258_v2 = vsel %vm548_vm0, -1e+30, %v468_v47  ;;  %vm2555_vm14 = vcmask 7168   ;;  %v2328_v44 = vld [vmem:[#allocation2 + $0x28] sm:$0xff] }
 0x1ee   :  { %vm2556_vm3 = vmmov %vm2555_vm14 }
 0x1ef   :  { %vm2557_vm2 = vmmov %vm2556_vm3 }
 0x1f0   :  { %592 = vmax.xlane.f32.xlu1 %v2208_v52  ;;  %vm2558_vm4 = vmmov %vm2557_vm2 }
 0x1f1   :  { %590 = vmax.xlane.f32.xlu0 %v2222_v59  ;;  %vm2559_vm5 = vmmov %vm2557_vm2 }
 0x1f2   :  { %vm2560_vm6 = vmmov %vm2557_vm2 }
 0x1f3   :  { %vm2561_vm8 = vmmov %vm2557_vm2 }
 0x1f4   :  { %608 = vmax.xlane.f32.xlu1 %v2231_v63  ;;  %vm2562_vm9 = vmmov %vm2557_vm2 }
 0x1f5   :  { %606 = vmax.xlane.f32.xlu0 %v2236_v18  ;;  %vm2564_vm7 = vmmov %vm2557_vm2 }
 0x1f6   :  { %vm2566_vm10 = vmmov %vm2557_vm2 }
 0x1f7   :  { %vm2569_vm11 = vmmov %vm2557_vm2 }
 0x1f8   :  { %596 = vmax.xlane.f32.xlu1 %v2245_v17  ;;  %vm2570_vm12 = vmmov %vm2557_vm2 }
 0x1f9   :  { %594 = vmax.xlane.f32.xlu0 %v2250_v0  ;;  %vm2571_vm1 = vmmov %vm2557_vm2 }
 0x1fa   :  { %vm2572_vm15 = vmmov %vm2571_vm1 }
 0x1fb   :  { %vm2573_vm13 = vmmov %vm2571_vm1 }
 0x1fc   :  { %612 = vmax.xlane.f32.xlu1 %v2255_v4  ;;  %vm2574_vm0 = vmmov %vm2571_vm1 }
 0x1fd   :  { %610 = vmax.xlane.f32.xlu0 %v2258_v2 }
 0x26d   :  { %v585_v6 = vpop.xlane.xlu1 %584 }
 0x26e   :  { %v2267_v25 = vmax.f32 %v2262_v1, %v585_v6  ;;  %v583_v5 = vpop.xlane.xlu0 %582  ;;  %v2338_v6 = vld [vmem:[#allocation2 + $0x20] sm:$0xff] }
 0x26f   :  { %v2270_v7 = vmax.f32 %v2264_v3, %v583_v5 }
 0x270   :  { %904 = vst.msk [vmem:[#allocation2 + $0x8] sm:$0xff] %vm2555_vm14, %v2267_v25  ;;  %717 = vperm.xlu1 %1440, %v2267_v25   ;;  %vm2575_vm14 = vmmov %vm2574_vm0 }
 0x271   :  { %903 = vst.msk [vmem:[#allocation2] sm:$0xff] %vm2556_vm3, %v2270_v7  ;;  %v601_v11 = vpop.xlane.xlu1 %600  ;;  %vm2576_vm3 = vmmov %vm2574_vm0 }
 0x272   :  { %v2286_v12 = vmax.f32 %v2272_v8, %v601_v11  ;;  %v599_v15 = vpop.xlane.xlu0 %598  ;;  %v2357_v11 = vld [vmem:[#allocation2 + $0x60] sm:$0xff] }
 0x273   :  { %v2289_v16 = vmax.f32 %v2279_v22, %v599_v15  ;;  %2565 = vst [vmem:[#allocation12_spill] sm:$0xff] %v2357_v11 }
 0x274   :  { %912 = vst.msk [vmem:[#allocation2 + $0x48] sm:$0xff] %vm2557_vm2, %v2286_v12  ;;  %757 = vperm.xlu0 %1441, %v2286_v12   ;;  %vm2577_vm2 = vmmov %vm2574_vm0 }
 0x275   :  { %911 = vst.msk [vmem:[#allocation2 + $0x40] sm:$0xff] %vm2558_vm4, %v2289_v16  ;;  %v589_v42 = vpop.xlane.xlu1 %588  ;;  %752 = vperm.xlu1 %1440, %v2289_v16   ;;  %vm2578_vm4 = vmmov %vm2574_vm0 }
 0x276   :  { %v2306_v24 = vmax.f32 %v2291_v34, %v589_v42  ;;  %v587_v53 = vpop.xlane.xlu0 %586 }
 0x277   :  { %v2309_v54 = vmax.f32 %v2298_v38, %v587_v53  ;;  %v2348_v53 = vld [vmem:[#allocation2 + $0x68] sm:$0xff] }
 0x278   :  { %906 = vst.msk [vmem:[#allocation2 + $0x18] sm:$0xff] %vm2559_vm5, %v2306_v24  ;;  %712 = vperm.xlu0 %1441, %v2270_v7   ;;  %2563 = vst [vmem:[#allocation11_spill] sm:$0xff] %v2348_v53 }
 0x279   :  { %905 = vst.msk [vmem:[#allocation2 + $0x10] sm:$0xff] %vm2560_vm6, %v2309_v54  ;;  %v605_v35 = vpop.xlane.xlu1 %604  ;;  %727 = vperm.xlu1 %1440, %v2306_v24   ;;  %vm2579_vm5 = vmmov %vm2574_vm0 }
 0x27a   :  { %v2326_v30 = vmax.f32 %v2311_v57, %v605_v35  ;;  %v603_v43 = vpop.xlane.xlu0 %602  ;;  %vm2580_vm6 = vmmov %vm2574_vm0 }
 0x27b   :  { %v2331_v47 = vmax.f32 %v2318_v31, %v603_v43 }
 0x27c   :  { %914 = vst.msk [vmem:[#allocation2 + $0x58] sm:$0xff] %vm2561_vm8, %v2326_v30  ;;  %767 = vperm.xlu0 %1441, %v2326_v30   ;;  %vm2581_vm8 = vmmov %vm2574_vm0 }
 0x27d   :  { %v593_v5 = vpop.xlane.xlu1 %592  ;;  %913 = vst.msk [vmem:[#allocation2 + $0x50] sm:$0xff] %vm2562_vm9, %v2331_v47  ;;  %722 = vperm.xlu1 %1440, %v2309_v54   ;;  %vm2582_vm9 = vmmov %vm2574_vm0 }
 0x27e   :  { %v2346_v15 = vmax.f32 %v2328_v44, %v593_v5  ;;  %v591_v42 = vpop.xlane.xlu0 %590  ;;  %v2377_v5 = vld [vmem:[#allocation2 + $0x30] sm:$0xff] }
 0x27f   :  { %v2351_v35 = vmax.f32 %v2338_v6, %v591_v42 }
 0x280   :  { %908 = vst.msk [vmem:[#allocation2 + $0x28] sm:$0xff] %vm2564_vm7, %v2346_v15  ;;  %vm2583_vm7 = vmmov %vm2574_vm0 }
 0x281   :  { %v609_v32 = vpop.xlane.xlu1 %608  ;;  %762 = vperm.xlu1 %1440, %v2331_v47   ;;  %907 = vst.msk [vmem:[#allocation2 + $0x20] sm:$0xff] %vm2566_vm10, %v2351_v35  ;;  %vm2584_vm10 = vmmov %vm2574_vm0 }
 0x282   :  { %v2365_v42 = vmax.f32 %v2348_v53, %v609_v32  ;;  %v607_v60 = vpop.xlane.xlu0 %606  ;;  %v2396_v53 = vld [vmem:[#allocation2 + $0x70] sm:$0xff] }
 0x283   :  { %v2370_v43 = vmax.f32 %v2357_v11, %v607_v60 }
 0x284   :  { %2567 = vst [vmem:[#allocation13_spill] sm:$0xff] %v2365_v42  ;;  %916 = vst.msk [vmem:[#allocation2 + $0x68] sm:$0xff] %vm2569_vm11, %v2365_v42  ;;  %777 = vperm.xlu0 %1441, %v2365_v42  }
 0x285   :  { %v597_v33 = vpop.xlane.xlu1 %596  ;;  %737 = vperm.xlu1 %1440, %v2346_v15   ;;  %915 = vst.msk [vmem:[#allocation2 + $0x60] sm:$0xff] %vm2570_vm12, %v2370_v43  ;;  %vm2585_vm11 = vmmov %vm2574_vm0 }
 0x286   :  { %v2385_v60 = vmax.f32 %v2367_v20, %v597_v33  ;;  %v595_v28 = vpop.xlane.xlu0 %594  ;;  %vm2586_vm12 = vmmov %vm2574_vm0 }
 0x287   :  { %v2390_v21 = vmax.f32 %v2377_v5, %v595_v28 }
 0x288   :  { %910 = vst.msk [vmem:[#allocation2 + $0x38] sm:$0xff] %vm2571_vm1, %v2385_v60  ;;  %vm2587_vm1 = vmmov %vm2574_vm0 }
 0x289   :  { %v613_v32 = vpop.xlane.xlu1 %612  ;;  %732 = vperm.xlu1 %1440, %v2351_v35   ;;  %909 = vst.msk [vmem:[#allocation2 + $0x30] sm:$0xff] %vm2572_vm15, %v2390_v21  ;;  %vm2588_vm15 = vmmov %vm2574_vm0 }
 0x28a   :  { %v2404_v28 = vmax.f32 %v2387_v19, %v613_v32  ;;  %v611_v11 = vpop.xlane.xlu0 %610 }
 0x28b   :  { %v2407_v42 = vmax.f32 %v2396_v53, %v611_v11 }
 0x28c   :  { %v645_v20 = vsub.f32 %v2387_v19, %v2404_v28  ;;  %918 = vst.msk [vmem:[#allocation2 + $0x78] sm:$0xff] %vm2573_vm13, %v2404_v28  ;;  %787 = vperm.xlu0 %1441, %v2404_v28   ;;  %vm2598_vm13 = vmmov %vm2574_vm0 }
 0x28d   :  { %772 = vperm.xlu1 %1440, %v2370_v43   ;;  %v644_v33 = vsub.f32 %v2396_v53, %v2407_v42  ;;  %917 = vst.msk [vmem:[#allocation2 + $0x70] sm:$0xff] %vm2574_vm0, %v2407_v42 }
 0x28f   :  { %v674_v19 = vmul.f32 1.442695, %v644_v33 }
 0x291   :  { %747 = vperm.xlu1 %1440, %v2385_v60  }
 0x295   :  { %742 = vperm.xlu1 %1440, %v2390_v21  }
 0x299   :  { %782 = vperm.xlu1 %1440, %v2407_v42  }
 0x2ab   :  { %1048 = vadd.xlane.f32.xlu0 %v2098_v10 }
 0x2af   :  { %1052 = vadd.xlane.f32.xlu0 %v2132_v58 }
 0x2b3   :  { %1056 = vadd.xlane.f32.xlu0 %v2166_v36 }
 0x2b7   :  { %1060 = vadd.xlane.f32.xlu0 %v2200_v48 }
 0x2bb   :  { %1064 = vadd.xlane.f32.xlu0 %v2103_v9 }
 0x2bd   :  { %1050 = vadd.xlane.f32.xlu1 %v2111_v46 }
 0x2bf   :  { %1068 = vadd.xlane.f32.xlu0 %v2137_v61 }
 0x2c1   :  { %1054 = vadd.xlane.f32.xlu1 %v2145_v26 }
 0x2c3   :  { %1072 = vadd.xlane.f32.xlu0 %v2171_v39 }
 0x2c5   :  { %1058 = vadd.xlane.f32.xlu1 %v2179_v13 }
 0x2c9   :  { %1062 = vadd.xlane.f32.xlu1 %v2205_v51 }
 0x2cd   :  { %1066 = vadd.xlane.f32.xlu1 %v2116_v49 }
 0x2d1   :  { %1070 = vadd.xlane.f32.xlu1 %v2150_v23 }
 0x2d5   :  { %1074 = vadd.xlane.f32.xlu1 %v2184_v40 }
 0x2ef   :  { %v718_v10 = vpop.permute.xlu1 %717 }
 0x2f0   :  { %v791_v9 = vsub.f32 %v2084_v41, %v718_v10 }
 0x2f2   :  { %v808_v46 = vmul.f32 1.442695, %v791_v9 }
 0x2f3   :  { %v758_v58 = vpop.permute.xlu0 %757 }
 0x2f4   :  { %1506 = vpow2.f32 %v808_v46  ;;  %v799_v61 = vsub.f32 %v2106_v45, %v758_v58  ;;  %v753_v26 = vpop.permute.xlu1 %752 }
 0x2f5   :  { %v798_v39 = vsub.f32 %v2118_v50, %v753_v26 }
 0x2f6   :  { %v824_v36 = vmul.f32 1.442695, %v799_v61 }
 0x2f7   :  { %v713_v13 = vpop.permute.xlu0 %712  ;;  %v822_v51 = vmul.f32 1.442695, %v798_v39 }
 0x2f8   :  { %1508 = vpow2.f32 %v824_v36  ;;  %v790_v49 = vsub.f32 %v2091_v37, %v713_v13  ;;  %v728_v48 = vpop.permute.xlu1 %727 }
 0x2f9   :  { %v793_v23 = vsub.f32 %v2140_v62, %v728_v48 }
 0x2fa   :  { %v806_v40 = vmul.f32 1.442695, %v790_v49 }
 0x2fb   :  { %v812_v11 = vmul.f32 1.442695, %v793_v23  ;;  %v768_v41 = vpop.permute.xlu0 %767 }
 0x2fc   :  { %1510 = vpow2.f32 %v806_v40  ;;  %v801_v32 = vsub.f32 %v2174_v14, %v768_v41  ;;  %v723_v10 = vpop.permute.xlu1 %722 }
 0x2fd   :  { %1512 = vpow2.f32 %v812_v11  ;;  %v792_v45 = vsub.f32 %v2152_v27, %v723_v10 }
 0x2fe   :  { %v1507_v9 = vpop.eup %1506  ;;  %v828_v50 = vmul.f32 1.442695, %v801_v32  ;;  %1514 = vpow2.f32 %v822_v51 }
 0x2ff   :  { %840 = vadd.xlane.f32.xlu0 %v1507_v9  ;;  %v810_v37 = vmul.f32 1.442695, %v792_v45 }
 0x300   :  { %1516 = vpow2.f32 %v828_v50  ;;  %v763_v46 = vpop.permute.xlu1 %762 }
 0x301   :  { %v800_v62 = vsub.f32 %v2186_v29, %v763_v46  ;;  %1518 = vpow2.f32 %v810_v37 }
 0x302   :  { %v1509_v58 = vpop.eup %1508 }
 0x303   :  { %856 = vadd.xlane.f32.xlu0 %v1509_v58  ;;  %v778_v61 = vpop.permute.xlu0 %777  ;;  %v826_v26 = vmul.f32 1.442695, %v800_v62 }
 0x304   :  { %v803_v14 = vsub.f32 %v2231_v63, %v778_v61  ;;  %v738_v36 = vpop.permute.xlu1 %737 }
 0x305   :  { %v795_v39 = vsub.f32 %v2208_v52, %v738_v36  ;;  %1520 = vpow2.f32 %v826_v26 }
 0x306   :  { %v1511_v27 = vpop.eup %1510  ;;  %v832_v48 = vmul.f32 1.442695, %v803_v14 }
 0x307   :  { %v1513_v13 = vpop.eup %1512  ;;  %v816_v49 = vmul.f32 1.442695, %v795_v39  ;;  %838 = vadd.xlane.f32.xlu1 %v1511_v27 }
 0x308   :  { %v733_v23 = vpop.permute.xlu1 %732  ;;  %844 = vadd.xlane.f32.xlu0 %v1513_v13  ;;  %v1515_v40 = vpop.eup %1514 }
 0x309   :  { %1522 = vpow2.f32 %v816_v49  ;;  %v794_v29 = vsub.f32 %v2222_v59, %v733_v23 }
 0x30a   :  { %v1517_v51 = vpop.eup %1516  ;;  %1524 = vpow2.f32 %v832_v48  ;;  %v1016_v48 = vld [vmem:[#allocation4] sm:$0xff] }
 0x30b   :  { %v814_v11 = vmul.f32 1.442695, %v794_v29  ;;  %854 = vadd.xlane.f32.xlu1 %v1515_v40  ;;  %v788_v52 = vpop.permute.xlu0 %787  ;;  %v1519_v32 = vpop.eup %1518 }
 0x30c   :  { %v773_v63 = vpop.permute.xlu1 %772  ;;  %860 = vadd.xlane.f32.xlu0 %v1517_v51  ;;  %v805_v45 = vsub.f32 %v2255_v4, %v788_v52 }
 0x30d   :  { %1526 = vpow2.f32 %v814_v11  ;;  %v802_v41 = vsub.f32 %v2236_v18, %v773_v63  ;;  %v1020_v11 = vld [vmem:[#allocation4 + $0x20] sm:$0xff] }
 0x30e   :  { %v836_v62 = vmul.f32 1.442695, %v805_v45  ;;  %v1017_v45 = vld [vmem:[#allocation4 + $0x8] sm:$0xff] }
 0x30f   :  { %v830_v10 = vmul.f32 1.442695, %v802_v41  ;;  %842 = vadd.xlane.f32.xlu1 %v1519_v32  ;;  %v1521_v59 = vpop.eup %1520  ;;  %v1022_v41 = vld [vmem:[#allocation4 + $0x30] sm:$0xff] }
 0x310   :  { %v748_v9 = vpop.permute.xlu1 %747 }
 0x311   :  { %1528 = vpow2.f32 %v830_v10  ;;  %v797_v50 = vsub.f32 %v2245_v17, %v748_v9  ;;  %v1024_v10 = vld [vmem:[#allocation4 + $0x40] sm:$0xff] }
 0x313   :  { %v1523_v37 = vpop.eup %1522  ;;  %v820_v46 = vmul.f32 1.442695, %v797_v50  ;;  %858 = vadd.xlane.f32.xlu1 %v1521_v59  ;;  %v1026_v59 = vld [vmem:[#allocation4 + $0x50] sm:$0xff] }
 0x314   :  { %v743_v58 = vpop.permute.xlu1 %742  ;;  %848 = vadd.xlane.f32.xlu0 %v1523_v37  ;;  %v1525_v18 = vpop.eup %1524 }
 0x315   :  { %1530 = vpow2.f32 %v820_v46  ;;  %v796_v61 = vsub.f32 %v2250_v0, %v743_v58 }
 0x316   :  { %1532 = vpow2.f32 %v836_v62  ;;  %v1019_v62 = vld [vmem:[#allocation4 + $0x18] sm:$0xff] }
 0x317   :  { %v1527_v26 = vpop.eup %1526  ;;  %v818_v14 = vmul.f32 1.442695, %v796_v61 }
 0x318   :  { %v783_v36 = vpop.permute.xlu1 %782  ;;  %846 = vadd.xlane.f32.xlu1 %v1527_v26  ;;  %864 = vadd.xlane.f32.xlu0 %v1525_v18  ;;  %v1028_v18 = vld [vmem:[#allocation4 + $0x60] sm:$0xff] }
 0x319   :  { %1534 = vpow2.f32 %v818_v14  ;;  %v804_v17 = vsub.f32 %v2258_v2, %v783_v36  ;;  %v1018_v2 = vld [vmem:[#allocation4 + $0x10] sm:$0xff]  ;;  %v1021_v36 = vld [vmem:[#allocation4 + $0x28] sm:$0xff] }
 0x31b   :  { %v1529_v4 = vpop.eup %1528  ;;  %v834_v39 = vmul.f32 1.442695, %v804_v17 }
 0x31c   :  { %862 = vadd.xlane.f32.xlu1 %v1529_v4 }
 0x31d   :  { %1536 = vpow2.f32 %v834_v39 }
 0x31f   :  { %v1531_v27 = vpop.eup %1530 }
 0x320   :  { %852 = vadd.xlane.f32.xlu0 %v1531_v27  ;;  %v1533_v13 = vpop.eup %1532  ;;  %v1023_v27 = vld [vmem:[#allocation4 + $0x38] sm:$0xff] }
 0x323   :  { %v1535_v49 = vpop.eup %1534 }
 0x324   :  { %850 = vadd.xlane.f32.xlu1 %v1535_v49  ;;  %868 = vadd.xlane.f32.xlu0 %v1533_v13 }
 0x327   :  { %v1537_v0 = vpop.eup %1536 }
 0x328   :  { %866 = vadd.xlane.f32.xlu1 %v1537_v0  ;;  %1076 = vadd.xlane.f32.xlu0 %v2213_v55  ;;  %v1025_v0 = vld [vmem:[#allocation4 + $0x48] sm:$0xff] }
 0x32c   :  { %1078 = vadd.xlane.f32.xlu1 %v2218_v56 }
 0x338   :  { %v1049_v23 = vpop.xlane.xlu0 %1048 }
 0x339   :  { %v1080_v40 = vadd.f32 %v1049_v23, %v1016_v48 }
 0x33b   :  { %1096 = vst.msk [vmem:[#allocation4] sm:$0xff] %vm2575_vm14, %v1080_v40  ;;  %v1027_v40 = vld [vmem:[#allocation4 + $0x58] sm:$0xff]  ;;  %vm2605_vm14 = vmmov %vm2574_vm0 }
 0x33c   :  { %v1053_v29 = vpop.xlane.xlu0 %1052 }
 0x33d   :  { %v1082_v51 = vadd.f32 %v1053_v29, %v1018_v2 }
 0x33f   :  { %1098 = vst.msk [vmem:[#allocation4 + $0x10] sm:$0xff] %vm2576_vm3, %v1082_v51  ;;  %v1029_v51 = vld [vmem:[#allocation4 + $0x68] sm:$0xff]  ;;  %vm2606_vm3 = vmmov %vm2574_vm0 }
 0x340   :  { %v1057_v63 = vpop.xlane.xlu0 %1056 }
 0x341   :  { %v1084_v52 = vadd.f32 %v1057_v63, %v1020_v11 }
 0x343   :  { %1100 = vst.msk [vmem:[#allocation4 + $0x20] sm:$0xff] %vm2577_vm2, %v1084_v52  ;;  %v2589_v52 = vsub.f32 %v2262_v1, %v2267_v25  ;;  %v2594_v25 = vsub.f32 %v2311_v57, %v2326_v30  ;;  %v2597_v57 = vsub.f32 %v2328_v44, %v2346_v15  ;;  %vm2609_vm2 = vmmov %vm2574_vm0 }
 0x344   :  { %v1061_v32 = vpop.xlane.xlu0 %1060 }
 0x345   :  { %v1086_v55 = vadd.f32 %v1061_v32, %v1022_v41  ;;  %v648_v41 = vmul.f32 1.442695, %v2589_v52  ;;  %v2590_v32 = vsub.f32 %v2272_v8, %v2286_v12  ;;  %v668_v8 = vmul.f32 1.442695, %v2594_v25  ;;  %v688_v25 = vld [vmem:[#allocation3 + $0x50] sm:$0xff] }
 0x346   :  { %v656_v30 = vmul.f32 1.442695, %v2597_v57 }
 0x347   :  { %1102 = vst.msk [vmem:[#allocation4 + $0x30] sm:$0xff] %vm2578_vm4, %v1086_v55  ;;  %1538 = vpow2.f32 %v648_v41  ;;  %v664_v55 = vmul.f32 1.442695, %v2590_v32  ;;  %v680_v41 = vld [vmem:[#allocation3 + $0x10] sm:$0xff]  ;;  %vm2610_vm4 = vmmov %vm2574_vm0 }
 0x348   :  { %v1065_v56 = vpop.xlane.xlu0 %1064 }
 0x349   :  { %v1088_v9 = vadd.f32 %v1065_v56, %v1024_v10  ;;  %v2591_v10 = vsub.f32 %v2264_v3, %v2270_v7  ;;  %1540 = vpow2.f32 %v664_v55  ;;  %v2595_v3 = vsub.f32 %v2298_v38, %v2309_v54 }
 0x34a   :  { %v1051_v50 = vpop.xlane.xlu1 %1050 }
 0x34b   :  { %1104 = vst.msk [vmem:[#allocation4 + $0x40] sm:$0xff] %vm2579_vm5, %v1088_v9  ;;  %v1081_v37 = vadd.f32 %v1051_v50, %v1017_v45  ;;  %v646_v56 = vmul.f32 1.442695, %v2591_v10  ;;  %v2592_v45 = vsub.f32 %v2291_v34, %v2306_v24  ;;  %v2593_v50 = vsub.f32 %v2279_v22, %v2289_v16  ;;  %v2607_v10 = vld [vmem:[#allocation14_spill] sm:$0xff]  ;;  %vm2612_vm5 = vmmov %vm2574_vm0 }
 0x34c   :  { %v1069_v46 = vpop.xlane.xlu0 %1068  ;;  %v650_v7 = vmul.f32 1.442695, %v2595_v3  ;;  %v2596_v22 = vsub.f32 %v2318_v31, %v2331_v47  ;;  %v2600_v31 = vld [vmem:[#allocation11_spill] sm:$0xff]  ;;  %v2601_v47 = vld [vmem:[#allocation13_spill] sm:$0xff]  ;;  %v2611_v3 = vsub.f32 %v2377_v5, %v2390_v21 }
 0x34d   :  { %1097 = vst.msk [vmem:[#allocation4 + $0x8] sm:$0xff] %vm2580_vm6, %v1081_v37  ;;  %v1090_v58 = vadd.f32 %v1069_v46, %v1026_v59  ;;  %v652_v9 = vmul.f32 1.442695, %v2592_v45  ;;  %1542 = vpow2.f32 %v646_v56  ;;  %v662_v1 = vmul.f32 1.442695, %v2593_v50  ;;  %v679_v59 = vld [vmem:[#allocation3 + $0x8] sm:$0xff]  ;;  %vm2613_vm6 = vmmov %vm2574_vm0 }
 0x34e   :  { %v1055_v61 = vpop.xlane.xlu1 %1054  ;;  %v687_v46 = vld [vmem:[#allocation3 + $0x48] sm:$0xff]  ;;  %v666_v16 = vmul.f32 1.442695, %v2596_v22  ;;  %v2608_v56 = vsub.f32 %v2607_v10, %v2385_v60 }
 0x34f   :  { %1106 = vst.msk [vmem:[#allocation4 + $0x50] sm:$0xff] %vm2581_vm8, %v1090_v58  ;;  %v1083_v26 = vadd.f32 %v1055_v61, %v1019_v62  ;;  %1544 = vpow2.f32 %v652_v9  ;;  %v678_v61 = vld [vmem:[#allocation3] sm:$0xff]  ;;  %vm2614_vm8 = vmmov %vm2574_vm0 }
 0x350   :  { %v1073_v14 = vpop.xlane.xlu0 %1072  ;;  %1546 = vpow2.f32 %v662_v1  ;;  %v660_v45 = vmul.f32 1.442695, %v2608_v56 }
 0x351   :  { %1099 = vst.msk [vmem:[#allocation4 + $0x18] sm:$0xff] %vm2582_vm9, %v1083_v26  ;;  %v1092_v17 = vadd.f32 %v1073_v14, %v1028_v18  ;;  %v1539_v12 = vpop.eup %1538  ;;  %1548 = vpow2.f32 %v668_v8  ;;  %v681_v14 = vld [vmem:[#allocation3 + $0x18] sm:$0xff]  ;;  %vm2615_vm9 = vmmov %vm2574_vm0 }
 0x352   :  { %v1059_v4 = vpop.xlane.xlu1 %1058  ;;  %v695_v34 = vmul.f32 %v1539_v12, %v679_v59  ;;  %1550 = vpow2.f32 %v650_v7  ;;  %v683_v59 = vld [vmem:[#allocation3 + $0x28] sm:$0xff]  ;;  %v658_v7 = vmul.f32 1.442695, %v2611_v3 }
 0x353   :  { %1108 = vst.msk [vmem:[#allocation4 + $0x60] sm:$0xff] %vm2583_vm7, %v1092_v17  ;;  %v1085_v39 = vadd.f32 %v1059_v4, %v1021_v36  ;;  %v1541_v24 = vpop.eup %1540  ;;  %1552 = vpow2.f32 %v666_v16  ;;  %v2599_v36 = vsub.f32 %v2338_v6, %v2351_v35  ;;  %v2602_v4 = vsub.f32 %v2600_v31, %v2601_v47  ;;  %v2603_v6 = vld [vmem:[#allocation12_spill] sm:$0xff]  ;;  %vm2616_vm7 = vmmov %vm2574_vm0  ;;  %v1115_v47 = vld [vmem:[#allocation2] sm:$0xff] }
 0x354   :  { %v703_v58 = vmul.f32 %v1541_v24, %v687_v46  ;;  %1554 = vpow2.f32 %v656_v30  ;;  %v2604_v35 = vsub.f32 %v2603_v6, %v2370_v43  ;;  %v682_v30 = vld [vmem:[#allocation3 + $0x20] sm:$0xff] }
 0x355   :  { %1101 = vst.msk [vmem:[#allocation4 + $0x28] sm:$0xff] %vm2584_vm10, %v1085_v39  ;;  %v654_v17 = vmul.f32 1.442695, %v2599_v36  ;;  %v672_v44 = vmul.f32 1.442695, %v2602_v4  ;;  %v685_v36 = vld [vmem:[#allocation3 + $0x38] sm:$0xff]  ;;  %vm2617_vm10 = vmmov %vm2574_vm0 }
 0x356   :  { %v1063_v13 = vpop.xlane.xlu1 %1062 }
 0x357   :  { %v1087_v49 = vadd.f32 %v1063_v13, %v1023_v27  ;;  %v1543_v38 = vpop.eup %1542  ;;  %1556 = vpow2.f32 %v654_v17 }
 0x358   :  { %v694_v15 = vmul.f32 %v1543_v38, %v678_v61  ;;  %1558 = vpow2.f32 %v672_v44  ;;  %v690_v61 = vld [vmem:[#allocation3 + $0x60] sm:$0xff] }
 0x359   :  { %1103 = vst.msk [vmem:[#allocation4 + $0x38] sm:$0xff] %vm2585_vm11, %v1087_v49  ;;  %v1545_v18 = vpop.eup %1544  ;;  %v686_v49 = vld [vmem:[#allocation3 + $0x40] sm:$0xff]  ;;  %vm2618_vm11 = vmmov %vm2574_vm0 }
 0x35a   :  { %v1067_v48 = vpop.xlane.xlu1 %1066  ;;  %v1547_v39 = vpop.eup %1546  ;;  %v697_v13 = vmul.f32 %v1545_v18, %v681_v14 }
 0x35b   :  { %v1089_v23 = vadd.f32 %v1067_v48, %v1025_v0  ;;  %v1549_v0 = vpop.eup %1548 }
 0x35d   :  { %1105 = vst.msk [vmem:[#allocation4 + $0x48] sm:$0xff] %vm2586_vm12, %v1089_v23  ;;  %vm2619_vm12 = vmmov %vm2574_vm0 }
 0x35e   :  { %v1071_v2 = vpop.xlane.xlu1 %1070 }
 0x35f   :  { %v1091_v29 = vadd.f32 %v1071_v2, %v1027_v40  ;;  %v689_v40 = vld [vmem:[#allocation3 + $0x58] sm:$0xff] }
 0x360   :  { %v705_v52 = vmul.f32 %v1549_v0, %v689_v40  ;;  %v693_v0 = vld [vmem:[#allocation3 + $0x78] sm:$0xff] }
 0x361   :  { %1107 = vst.msk [vmem:[#allocation4 + $0x58] sm:$0xff] %vm2587_vm1, %v1091_v29  ;;  %v670_v29 = vmul.f32 1.442695, %v2604_v35  ;;  %vm2620_vm1 = vmmov %vm2574_vm0 }
 0x362   :  { %v1075_v11 = vpop.xlane.xlu1 %1074 }
 0x363   :  { %v1093_v63 = vadd.f32 %v1075_v11, %v1029_v51  ;;  %v702_v51 = vmul.f32 %v1547_v39, %v686_v49  ;;  %v1551_v11 = vpop.eup %1550  ;;  %1560 = vpow2.f32 %v670_v29  ;;  %v684_v49 = vld [vmem:[#allocation3 + $0x30] sm:$0xff] }
 0x364   :  { %v696_v43 = vmul.f32 %v1551_v11, %v680_v41  ;;  %v1553_v50 = vpop.eup %1552  ;;  %1562 = vpow2.f32 %v660_v45  ;;  %v1031_v45 = vld [vmem:[#allocation4 + $0x78] sm:$0xff] }
 0x365   :  { %1109 = vst.msk [vmem:[#allocation4 + $0x68] sm:$0xff] %vm2588_vm15, %v1093_v63  ;;  %v1555_v8 = vpop.eup %1554  ;;  %v704_v24 = vmul.f32 %v1553_v50, %v688_v25  ;;  %vm2621_vm15 = vmmov %vm2574_vm0 }
 0x38c   :  { %v841_v37 = vpop.xlane.xlu0 %840 }
 0x38d   :  { %v871_v62 = vadd.f32 %v841_v37, %v695_v34  ;;  %v676_v34 = vmul.f32 1.442695, %v645_v20  ;;  %v1557_v37 = vpop.eup %1556 }
 0x38e   :  { %v1559_v22 = vpop.eup %1558  ;;  %v698_v20 = vmul.f32 %v1557_v37, %v682_v30 }
 0x38f   :  { %888 = vst.msk [vmem:[#allocation3 + $0x8] sm:$0xff] %vm2598_vm13, %v871_v62  ;;  %v699_v62 = vmul.f32 %v1555_v8, %v683_v59  ;;  %v1561_v28 = vpop.eup %1560  ;;  %vm2622_vm13 = vmmov %vm2574_vm0 }
 0x390   :  { %v857_v54 = vpop.xlane.xlu0 %856  ;;  %v1563_v14 = vpop.eup %1562  ;;  %v706_v53 = vmul.f32 %v1561_v28, %v690_v61 }
 0x391   :  { %v879_v26 = vadd.f32 %v857_v54, %v703_v58  ;;  %v691_v58 = vld [vmem:[#allocation3 + $0x68] sm:$0xff] }
 0x392   :  { %v707_v5 = vmul.f32 %v1559_v22, %v691_v58 }
 0x393   :  { %896 = vst.msk [vmem:[#allocation3 + $0x48] sm:$0xff] %vm2574_vm0, %v879_v26 }
 0x394   :  { %v839_v27 = vpop.xlane.xlu1 %838 }
 0x395   :  { %v870_v48 = vadd.f32 %v839_v27, %v694_v15  ;;  %v845_v23 = vpop.xlane.xlu0 %844  ;;  %v701_v15 = vmul.f32 %v1563_v14, %v685_v36  ;;  %v1211_v27 = vld [vmem:[#allocation4] sm:$0xff] }
 0x396   :  { %v873_v2 = vadd.f32 %v845_v23, %v697_v13 }
 0x397   :  { %887 = vst.msk [vmem:[#allocation3] sm:$0xff] %vm2605_vm14, %v870_v48  ;;  %vm2623_vm14 = vmmov %vm2574_vm0 }
 0x398   :  { %890 = vst.msk [vmem:[#allocation3 + $0x18] sm:$0xff] %vm2606_vm3, %v873_v2  ;;  %v855_v63 = vpop.xlane.xlu1 %854 }
 0x399   :  { %v878_v32 = vadd.f32 %v855_v63, %v702_v51  ;;  %v861_v55 = vpop.xlane.xlu0 %860  ;;  %v692_v51 = vld [vmem:[#allocation3 + $0x70] sm:$0xff] }
 0x39a   :  { %v881_v9 = vadd.f32 %v861_v55, %v705_v52  ;;  %v1030_v52 = vld [vmem:[#allocation4 + $0x70] sm:$0xff] }
 0x39b   :  { %895 = vst.msk [vmem:[#allocation3 + $0x40] sm:$0xff] %vm2609_vm2, %v878_v32 }
 0x39c   :  { %898 = vst.msk [vmem:[#allocation3 + $0x58] sm:$0xff] %vm2610_vm4, %v881_v9  ;;  %v843_v1 = vpop.xlane.xlu1 %842 }
 0x39d   :  { %v872_v12 = vadd.f32 %v843_v1, %v696_v43 }
 0x39e   :  { %v1131_v60 = vld [vmem:[#allocation3] sm:$0xff] }
 0x39f   :  { %1564 = vlog2.f32 %v1131_v60  ;;  %889 = vst.msk [vmem:[#allocation3 + $0x10] sm:$0xff] %vm2612_vm5, %v872_v12 }
 0x3a0   :  { %v859_v46 = vpop.xlane.xlu1 %858  ;;  %1566 = vpow2.f32 %v658_v7 }
 0x3a1   :  { %v880_v16 = vadd.f32 %v859_v46, %v704_v24  ;;  %v849_v57 = vpop.xlane.xlu0 %848  ;;  %1568 = vpow2.f32 %v676_v34 }
 0x3a2   :  { %v875_v21 = vadd.f32 %v849_v57, %v699_v62  ;;  %1570 = vpow2.f32 %v674_v19 }
 0x3a3   :  { %897 = vst.msk [vmem:[#allocation3 + $0x50] sm:$0xff] %vm2613_vm6, %v880_v16 }
 0x3a4   :  { %892 = vst.msk [vmem:[#allocation3 + $0x28] sm:$0xff] %vm2614_vm8, %v875_v21 }
 0x3a5   :  { %v847_v38 = vpop.xlane.xlu1 %846  ;;  %v865_v54 = vpop.xlane.xlu0 %864 }
 0x3a6   :  { %v874_v18 = vadd.f32 %v847_v38, %v698_v20  ;;  %v883_v26 = vadd.f32 %v865_v54, %v707_v5 }
 0x3a8   :  { %891 = vst.msk [vmem:[#allocation3 + $0x20] sm:$0xff] %vm2615_vm9, %v874_v18 }
 0x3a9   :  { %900 = vst.msk [vmem:[#allocation3 + $0x68] sm:$0xff] %vm2616_vm7, %v883_v26  ;;  %v1565_v42 = vpop.eup %1564  ;;  %v863_v33 = vpop.xlane.xlu1 %862 }
 0x3aa   :  { %v1148_v17 = vmul.f32 0.6931472, %v1565_v42  ;;  %v882_v31 = vadd.f32 %v863_v33, %v706_v53  ;;  %v1567_v4 = vpop.eup %1566 }
 0x3ab   :  { %v1569_v39 = vpop.eup %1568  ;;  %v700_v40 = vmul.f32 %v1567_v4, %v684_v49 }
 0x3ac   :  { %v1179_v44 = vadd.f32 %v1148_v17, %v1115_v47  ;;  %899 = vst.msk [vmem:[#allocation3 + $0x60] sm:$0xff] %vm2617_vm10, %v882_v31  ;;  %v709_v2 = vmul.f32 %v1569_v39, %v693_v0  ;;  %v1571_v6 = vpop.eup %1570 }
 0x3ad   :  { %v853_v13 = vpop.xlane.xlu0 %852  ;;  %v708_v41 = vmul.f32 %v1571_v6, %v692_v51 }
 0x3ae   :  { %v1227_v48 = vsub.f32 %v1179_v44, %v1211_v27  ;;  %v877_v23 = vadd.f32 %v853_v13, %v701_v15 }
 0x3b0   :  { %1259 = vst.msk [vmem:[%s2540_s2] sm:$0xff] %vm2618_vm11, %v1227_v48 }
 0x3b1   :  { %894 = vst.msk [vmem:[#allocation3 + $0x38] sm:$0xff] %vm2619_vm12, %v877_v23  ;;  %v851_v35 = vpop.xlane.xlu1 %850  ;;  %v869_v29 = vpop.xlane.xlu0 %868 }
 0x3b2   :  { %v876_v11 = vadd.f32 %v851_v35, %v700_v40  ;;  %v885_v63 = vadd.f32 %v869_v29, %v709_v2 }
 0x3b4   :  { %893 = vst.msk [vmem:[#allocation3 + $0x30] sm:$0xff] %vm2620_vm1, %v876_v11 }
 0x3b5   :  { %902 = vst.msk [vmem:[#allocation3 + $0x78] sm:$0xff] %vm2621_vm15, %v885_v63  ;;  %v867_v32 = vpop.xlane.xlu1 %866  ;;  %v1077_v55 = vpop.xlane.xlu0 %1076 }
 0x3b6   :  { %v884_v10 = vadd.f32 %v867_v32, %v708_v41  ;;  %v1094_v56 = vadd.f32 %v1077_v55, %v1030_v52 }
 0x3b8   :  { %901 = vst.msk [vmem:[#allocation3 + $0x70] sm:$0xff] %vm2622_vm13, %v884_v10 }
 0x3b9   :  { %1110 = vst.msk [vmem:[#allocation4 + $0x70] sm:$0xff] %vm2574_vm0, %v1094_v56  ;;  %v1079_v9 = vpop.xlane.xlu1 %1078 }
 0x3ba   :  { %v1095_v43 = vadd.f32 %v1079_v9, %v1031_v45 }
 0x3bc   :  { %1111 = vst.msk [vmem:[#allocation4 + $0x78] sm:$0xff] %vm2623_vm14, %v1095_v43 }
 0x3bd   :  { %1279 = vsyncpa [#allocation6], 1 }
 0x3be   :  { %1280 = vsyncpa [#allocation8], 1 }

</bundles_post_ra>
